<compile_context>
chip_gen: v5e
topology: v5e:2x2
jax: 0.10.0
libtpu: 0.0.40
codegen_flags: <defaults>
</compile_context>

<pallas_src>
import functools

import jax
import jax.numpy as jnp
from jax import lax
from jax.experimental import pallas as pl
from jax.experimental.pallas import tpu as pltpu


def _conv_bn_kernel(x_ref, w_ref, shift_ref, o_ref, *,
                    KH, KW, Ho, Wo, Cout, stride, dilation):
    # x_ref:     (1, Hp, Wp, Cin)      padded NHWC image for one batch element
    # w_ref:     (KH*KW*Cin, Cout_p)   BN scale folded in, Cout padded to 128
    # shift_ref: (1, Cout_p)           beta - mean*scale (f32, zero padded)
    # o_ref:     (1, Cout, Ho*Wo)      NCHW-flat output (lane-dense along M)
    x = x_ref[0]                       # (Hp, Wp, Cin)
    cin = x.shape[-1]

    # im2col: gather the KH*KW taps and concatenate on the channel (lane)
    # axis so the whole conv is one MXU matmul with K = KH*KW*Cin.
    taps = []
    for kh in range(KH):
        for kw in range(KW):
            h0 = kh * dilation
            w0 = kw * dilation
            if stride == 1:
                patch = x[h0:h0 + Ho, w0:w0 + Wo, :]            # contiguous slice
            else:
                patch = x[h0:h0 + (Ho - 1) * stride + 1:stride,
                          w0:w0 + (Wo - 1) * stride + 1:stride, :]
            taps.append(patch)
    patches = jnp.concatenate(taps, axis=-1)                    # (Ho, Wo, KH*KW*Cin)
    lhs = patches.reshape(Ho * Wo, KH * KW * cin)               # (M, K)

    # Single matmul, native-dtype operands, f32 accumulate on the MXU.
    acc = jnp.dot(lhs, w_ref[...], preferred_element_type=jnp.float32)  # (M, Cout_p)

    # Folded-BN epilogue: scale already lives in the weights, add the shift,
    # cast, then transpose (M, Cout_p) -> (Cout_p, M) on the XLU so the store
    # is NCHW-flat and lane-dense along M.  Static sublane slice strips the
    # Cout padding before the store (output array is unpadded in HBM).
    y = (acc + shift_ref[0]).astype(o_ref.dtype)                # (M, Cout_p)
    yt = y.T                                                    # (Cout_p, M), aligned
    o_ref[0] = yt[:Cout, :]                                     # (Cout, M)


def basic_conv2d(x_nchw, weight_oihw, gamma, beta, running_mean, running_var,
                 *, stride=1, padding=0, dilation=1, eps=1e-5):
    """Forward of BasicConv2d: bn(conv(x)) — note: no ReLU in the reference forward."""
    x = jnp.transpose(x_nchw, (0, 2, 3, 1))                     # NCHW -> NHWC (tiny)
    N, H, W, Cin = x.shape
    Cout, _, KH, KW = weight_oihw.shape

    # Eval-mode BatchNorm folded into per-channel scale (into weights) + shift.
    scale = gamma / jnp.sqrt(running_var + eps)                 # (Cout,)
    shift = beta - running_mean * scale                         # (Cout,)

    # OIHW -> (KH, KW, Cin, Cout) -> fold scale -> (KH*KW*Cin, Cout),
    # zero-pad Cout up to a 128-lane multiple (resident, tiny).
    w = jnp.transpose(weight_oihw, (2, 3, 1, 0))
    w = (w * scale).astype(x.dtype).reshape(KH * KW * Cin, Cout)
    Coutp = ((Cout + 127) // 128) * 128
    w_p = jnp.pad(w, ((0, 0), (0, Coutp - Cout)))
    shift_p = jnp.pad(shift.astype(jnp.float32), (0, Coutp - Cout)).reshape(1, Coutp)

    xp = jnp.pad(x, ((0, 0), (padding, padding), (padding, padding), (0, 0)))
    Hp, Wp = H + 2 * padding, W + 2 * padding
    Ho = (Hp - dilation * (KH - 1) - 1) // stride + 1
    Wo = (Wp - dilation * (KW - 1) - 1) // stride + 1
    M = Ho * Wo

    kernel = functools.partial(
        _conv_bn_kernel, KH=KH, KW=KW, Ho=Ho, Wo=Wo, Cout=Cout,
        stride=stride, dilation=dilation)

    out_flat = pl.pallas_call(
        kernel,
        out_shape=jax.ShapeDtypeStruct((N, Cout, M), x.dtype),
        grid=(N,),
        in_specs=[
            pl.BlockSpec((1, Hp, Wp, Cin), lambda n: (n, 0, 0, 0)),
            pl.BlockSpec((KH * KW * Cin, Coutp), lambda n: (0, 0)),   # resident
            pl.BlockSpec((1, Coutp), lambda n: (0, 0)),               # resident
        ],
        out_specs=pl.BlockSpec((1, Cout, M), lambda n: (n, 0, 0)),
        compiler_params=pltpu.CompilerParams(
            dimension_semantics=("parallel",),       # batch axis across TCs
            vmem_limit_bytes=32 * 1024 * 1024),
    )(xp, w_p, shift_p)

    # Free reshape: (N, Cout, Ho*Wo) -> (N, Cout, Ho, Wo).  No transpose, no slice.
    return out_flat.reshape(N, Cout, Ho, Wo)


def _reference(x_nchw, weight_oihw, gamma, beta, running_mean, running_var,
               *, stride, padding, dilation, eps=1e-5):
    conv = lax.conv_general_dilated(
        x_nchw, weight_oihw,
        window_strides=(stride, stride),
        padding=((padding, padding), (padding, padding)),
        rhs_dilation=(dilation, dilation),
        dimension_numbers=("NCHW", "OIHW", "NCHW"))
    scale = gamma / jnp.sqrt(running_var + eps)
    shift = beta - running_mean * scale
    return conv * scale[None, :, None, None] + shift[None, :, None, None]


if __name__ == "__main__":
    # Module config: BasicConv2d(in_planes=4, out_planes=8, kernel_size=3,
    #                            stride=1, padding=1, dilation=1)
    N, Cin, H, W = 2, 4, 16, 16
    Cout, K = 8, 3
    stride, padding, dilation = 1, 1, 1

    key = jax.random.PRNGKey(0)
    kx, kw, kg, kb, km, kv = jax.random.split(key, 6)

    x = jax.random.normal(kx, (N, Cin, H, W), dtype=jnp.float32)
    weight = jax.random.normal(kw, (Cout, Cin, K, K), dtype=jnp.float32) * 0.1
    gamma = 1.0 + 0.1 * jax.random.normal(kg, (Cout,), dtype=jnp.float32)
    beta = 0.1 * jax.random.normal(kb, (Cout,), dtype=jnp.float32)
    running_mean = 0.1 * jax.random.normal(km, (Cout,), dtype=jnp.float32)
    running_var = jnp.abs(1.0 + 0.1 * jax.random.normal(kv, (Cout,), dtype=jnp.float32))

    out = basic_conv2d(x, weight, gamma, beta, running_mean, running_var,
                       stride=stride, padding=padding, dilation=dilation)
    out = jax.block_until_ready(out)

    ref = _reference(x, weight, gamma, beta, running_mean, running_var,
                     stride=stride, padding=padding, dilation=dilation)
    assert out.shape == (N, Cout, H, W), out.shape
    assert out.dtype == x.dtype, out.dtype
    assert jnp.allclose(out, ref, atol=1e-4, rtol=1e-4), "mismatch vs reference"

    print("KERNEL_OK")
</pallas_src>

<mosaic_0001>
module attributes {stable_mosaic.version = 11 : i64} {
  func.func @_conv_bn_kernel(%arg0: i32, %arg1: memref<1x18x18x4xf32, #tpu.memory_space<vmem>>, %arg2: memref<36x128xf32, #tpu.memory_space<vmem>>, %arg3: memref<1x128xf32, #tpu.memory_space<vmem>>, %arg4: memref<1x8x256xf32, #tpu.memory_space<vmem>>) attributes {dimension_semantics = [#tpu.dimension_semantics<parallel>], iteration_bounds = array<i64: 2>, scalar_prefetch = 0 : i64, scratch_operands = 0 : i64, tpu.core_type = #tpu.core_type<tc>, window_params = [{transform_indices = @transform_0, window_bounds = array<i64: 1, 18, 18, 4>}, {pipeline_mode = #tpu.pipeline_mode<synchronous>, transform_indices = @transform_1, window_bounds = array<i64: 36, 128>}, {pipeline_mode = #tpu.pipeline_mode<synchronous>, transform_indices = @transform_2, window_bounds = array<i64: 1, 128>}, {transform_indices = @transform_3, window_bounds = array<i64: 1, 8, 256>}]} {
    %c0 = arith.constant 0 : index
    %c0_0 = arith.constant 0 : index
    %c0_1 = arith.constant 0 : index
    %c0_2 = arith.constant 0 : index
    %0 = vector.load %arg1[%c0, %c0_0, %c0_1, %c0_2] : memref<1x18x18x4xf32, #tpu.memory_space<vmem>>, vector<1x18x18x4xf32>
    %1 = vector.shape_cast %0 : vector<1x18x18x4xf32> to vector<18x18x4xf32>
    %2 = vector.extract_strided_slice %1 {offsets = [0, 0, 0], sizes = [16, 16, 4], strides = [1, 1, 1]} : vector<18x18x4xf32> to vector<16x16x4xf32>
    %3 = vector.extract_strided_slice %1 {offsets = [0, 1, 0], sizes = [16, 16, 4], strides = [1, 1, 1]} : vector<18x18x4xf32> to vector<16x16x4xf32>
    %4 = vector.extract_strided_slice %1 {offsets = [0, 2, 0], sizes = [16, 16, 4], strides = [1, 1, 1]} : vector<18x18x4xf32> to vector<16x16x4xf32>
    %5 = vector.extract_strided_slice %1 {offsets = [1, 0, 0], sizes = [16, 16, 4], strides = [1, 1, 1]} : vector<18x18x4xf32> to vector<16x16x4xf32>
    %6 = vector.extract_strided_slice %1 {offsets = [1, 1, 0], sizes = [16, 16, 4], strides = [1, 1, 1]} : vector<18x18x4xf32> to vector<16x16x4xf32>
    %7 = vector.extract_strided_slice %1 {offsets = [1, 2, 0], sizes = [16, 16, 4], strides = [1, 1, 1]} : vector<18x18x4xf32> to vector<16x16x4xf32>
    %8 = vector.extract_strided_slice %1 {offsets = [2, 0, 0], sizes = [16, 16, 4], strides = [1, 1, 1]} : vector<18x18x4xf32> to vector<16x16x4xf32>
    %9 = vector.extract_strided_slice %1 {offsets = [2, 1, 0], sizes = [16, 16, 4], strides = [1, 1, 1]} : vector<18x18x4xf32> to vector<16x16x4xf32>
    %10 = vector.extract_strided_slice %1 {offsets = [2, 2, 0], sizes = [16, 16, 4], strides = [1, 1, 1]} : vector<18x18x4xf32> to vector<16x16x4xf32>
    %11 = tpu.concatenate %2, %3, %4, %5, %6, %7, %8, %9, %10 in 2 : vector<16x16x4xf32>, vector<16x16x4xf32>, vector<16x16x4xf32>, vector<16x16x4xf32>, vector<16x16x4xf32>, vector<16x16x4xf32>, vector<16x16x4xf32>, vector<16x16x4xf32>, vector<16x16x4xf32> -> vector<16x16x36xf32>
    %12 = vector.shape_cast %11 : vector<16x16x36xf32> to vector<256x36xf32>
    %c0_3 = arith.constant 0 : index
    %c0_4 = arith.constant 0 : index
    %13 = vector.load %arg2[%c0_3, %c0_4] : memref<36x128xf32, #tpu.memory_space<vmem>>, vector<36x128xf32>
    %cst = arith.constant dense<0.000000e+00> : vector<256x128xf32>
    %14 = tpu.matmul %12, %13, %cst {dimension_numbers = #tpu.dot_dimension_numbers<[1], [0], [0], [1], [0, 0, 1, 1], [], []>} : vector<256x36xf32>, vector<36x128xf32>, vector<256x128xf32> -> vector<256x128xf32>
    %c0_5 = arith.constant 0 : index
    %c0_6 = arith.constant 0 : index
    %15 = vector.load %arg3[%c0_5, %c0_6] : memref<1x128xf32, #tpu.memory_space<vmem>>, vector<1x128xf32>
    %16 = vector.shape_cast %15 : vector<1x128xf32> to vector<128xf32>
    %17 = vector.shape_cast %16 : vector<128xf32> to vector<1x128xf32>
    %18 = vector.broadcast %17 : vector<1x128xf32> to vector<256x128xf32>
    %19 = arith.addf %14, %18 : vector<256x128xf32>
    %20 = tpu.transpose %19, [1, 0] : vector<256x128xf32> -> vector<128x256xf32>
    %21 = vector.extract_strided_slice %20 {offsets = [0, 0], sizes = [8, 256], strides = [1, 1]} : vector<128x256xf32> to vector<8x256xf32>
    %c0_7 = arith.constant 0 : index
    %c0_8 = arith.constant 0 : index
    %c0_9 = arith.constant 0 : index
    %22 = vector.load %arg4[%c0_7, %c0_8, %c0_9] : memref<1x8x256xf32, #tpu.memory_space<vmem>>, vector<1x8x256xf32>
    %23 = vector.shape_cast %22 : vector<1x8x256xf32> to vector<8x256xf32>
    %24 = vector.shape_cast %21 : vector<8x256xf32> to vector<1x8x256xf32>
    tpu.vector_store %arg4[%c0_7, %c0_8, %c0_9], %24 {strides = array<i32>} : memref<1x8x256xf32, #tpu.memory_space<vmem>>, vector<1x8x256xf32>,
    return
  }
  func.func @transform_0(%arg0: i32) -> (i32, i32, i32, i32) {
    %c0_i32 = arith.constant 0 : i32
    %c0_i32_0 = arith.constant 0 : i32
    %c0_i32_1 = arith.constant 0 : i32
    %c0_i32_2 = arith.constant 0 : i32
    return %arg0, %c0_i32, %c0_i32_0, %c0_i32_1 : i32, i32, i32, i32
  }
  func.func @transform_1(%arg0: i32) -> (i32, i32) {
    %c0_i32 = arith.constant 0 : i32
    %c0_i32_0 = arith.constant 0 : i32
    %c0_i32_1 = arith.constant 0 : i32
    return %c0_i32, %c0_i32_0 : i32, i32
  }
  func.func @transform_2(%arg0: i32) -> (i32, i32) {
    %c0_i32 = arith.constant 0 : i32
    %c0_i32_0 = arith.constant 0 : i32
    %c0_i32_1 = arith.constant 0 : i32
    return %c0_i32, %c0_i32_0 : i32, i32
  }
  func.func @transform_3(%arg0: i32) -> (i32, i32, i32) {
    %c0_i32 = arith.constant 0 : i32
    %c0_i32_0 = arith.constant 0 : i32
    %c0_i32_1 = arith.constant 0 : i32
    return %arg0, %c0_i32, %c0_i32_0 : i32, i32, i32
  }
}

</mosaic_0001>

<bundles_post_ra>
// kernel: tpu_custom_call.1
= control target key start
LH: loop header
LB: loop body
LE: loop exit
PB: predicated region body
PF: predicated region fallthrough
CT: control target
= control target key end

     0   :  { %8 = vsyncpa [#allocation3], 0  ;;  %s4095_s0 = inlined_call_operand.vmem [shape: f32[2,18,18,4], index: 0, kind: input, shape index: {}]   ;;  %s4096_s1 = inlined_call_operand.vmem [shape: f32[36,128], index: 1, kind: input, shape index: {}]   ;;  %s4097_s2 = inlined_call_operand.vmem [shape: f32[1,128], index: 2, kind: input, shape index: {}]   ;;  %s4098_s3 = inlined_call_operand.hbm [shape: f32[2,8,256], index: 3, kind: output, shape index: {}]  }
   0x1   :  { %10 = vsyncpa [#allocation3 + $0x1], 0  ;;  %s2083_s12 = smov 0   ;;  %s2085_s13 = smov 0  }
   0x2   :  { %s2087_s14 = smov 0   ;;  %s2089_s15 = smov 0  }
   0x3 LB: > { %s2104_s16 = sadd.s32 4294967295, %s2053_s15   ;;  %s1856_s17 = sadd.s32 4294967294, %s2053_s15   ;;  %s2053_s15 = sphi %s2089_s15, %s4542_s15   ;;  %s2049_s14 = sphi %s2087_s14, %s4541_s14   ;;  %s2045_s13 = sphi %s2085_s13, %s4540_s13   ;;  %s2041_s12 = sphi %s2083_s12, %s4539_s12  }
   0x4   : > { %s2108_s18 = sadd.s32 1, %s2053_s15   ;;  %s91_s19 = sadd.s32 1, %s2049_s14 }
   0x5   : > { %s88_s20 = ssub.s32 %s2053_s15, %s2108_s18  ;;  %p101_p0 = scmp.ne.s32.totalorder %s2049_s14, %s2045_s13 }
   0x6   : > { %p89_p1 = scmp.eq.s32.totalorder %s88_s20, 0  ;;  %p102_p2 = scmp.eq.s32.totalorder %s2104_s16, 1 }
   0x7   : > { %p107_p3 = scmp.ne.s32.totalorder %s2045_s13, %s2041_s12  ;;  %p108_p4 = scmp.eq.s32.totalorder %s1856_s17, 1 }
   0x8   : > { %s2119_s21 = scalar_select %p89_p1, %s2049_s14, %s91_s19  }
   0x9   : > { %p2121_p5 = por %p102_p2, %p101_p0  ;;  %p2125_p6 = por %p108_p4, %p107_p3 }
   0xa   : > { %p1859_p7 = scmp.ge.s32.totalorder %s2053_s15, 1  ;;  %p140_p8 = scmp.lt.s32.totalorder %s2053_s15, 3 }
   0xc   : > { %p141_p9 = pnand %p1859_p7, %p140_p8 }
   0xe   : > { %144 = sbr.rel (%p141_p9) target bundleno = 1019 (0x3fb), region = 32 }
  0x13   : > { %p164_p10 = scmp.lt.s32.totalorder %s2104_s16, 1  ;;  %vm271_vm0 = vcmask 1046528   ;;  %s2055_s29 = smov 4   ;;  %vm448_vm1 = vcmask 1045504   ;;  %vm1227_vm2 = vcmask 31744   ;;  %vm1260_vm3 = vcmask 64512  }
  0x14   : > { %s2056_s30 = smov 8   ;;  %s2057_s4 = smov 12   ;;  %vm1293_vm4 = vcmask 97280   ;;  %vm1326_vm5 = vcmask 130048   ;;  %vm1359_vm6 = vcmask 162816   ;;  %vm1392_vm7 = vcmask 195584  }
  0x15   : > { %s165_s24 = scalar_select %p164_p10, %s2104_s16, 1  ;;  %vm1597_vm8 = vcmask 1043456   ;;  %vm1425_vm9 = vcmask 228352   ;;  %vm1458_vm10 = vcmask 261120   ;;  %vm1500_vm11 = vcmask 293888  }
  0x16   : > { %s2058_s5 = smov 16   ;;  %s2059_s6 = smov 20  }
  0x17   : > { %s1916_s25 = smul.u32 432, %s165_s24  ;;  %s2060_s7 = smov 24  }
  0x18   : > { %s2061_s8 = smov 28   ;;  %s2062_s9 = smov 32  }
  0x19   : > { %s2136_s28 = scalar_lea.vmem %s4095_s0, %s1916_s25  ;;  %s2011_s26 = scalar_lea.hbm %s4098_s3, 32 }
  0x1a   : > { %v2139_v0 = vld [vmem:[%s2136_s28 + $0x30] sm:$0xff]  ;;  %v2142_v1 = vld [vmem:[%s2136_s28 + $0x38] sm:$0xff]  ;;  %v2150_v5 = vld [vmem:[%s2136_s28 + $0x20] sm:$0xff] }
  0x1b   : > { %v2145_v2 = vld [vmem:[%s2136_s28 + $0x18] sm:$0xff]  ;;  %v282_v3 = vrot.slane %v2139_v0, 1  ;;  %v283_v4 = vrot.slane %v2142_v1, 1  ;;  %v2154_v7 = vld [vmem:[%s2136_s28] sm:$0xff]  ;;  %v2157_v8 = vld [vmem:[%s2136_s28 + $0x8] sm:$0xff]  ;;  %v278_v9 = vrot.slane %v2150_v5, 1 }
  0x1c   : > { %v277_v6 = vrot.slane %v2145_v2, 1  ;;  %v272_v10 = vrot.slane %v2154_v7, 1  ;;  %v273_v11 = vrot.slane %v2157_v8, 1  ;;  %v2163_v12 = vld [vmem:[%s2136_s28 + $0x40] sm:$0x3]  ;;  %v2197_v25 = vld [vmem:[%s2136_s28 + $0x68] sm:$0xff] }
  0x1d   : > { %v2166_v13 = vsel %vm271_vm0, %v282_v3, %v283_v4  ;;  %v2169_v14 = vld [vmem:[%s2136_s28 + $0x28] sm:$0x3]  ;;  %v2172_v15 = vld [vmem:[%s2136_s28 + $0x10] sm:$0x3]  ;;  %v285_v18 = vrot.slane %v2163_v12, 1  ;;  %v2194_v24 = vld [vmem:[%s2136_s28 + $0x60] sm:$0xff] }
  0x1e   : > { %4199 = vst [vmem:[#allocation5_spill] sm:$0xff] %v2166_v13  ;;  %360 = vrot.lane.b32.xlu2 %v2166_v13, %s2055_s29  ;;  %v2177_v16 = vsel %vm271_vm0, %v277_v6, %v278_v9  ;;  %v274_v17 = vsel %vm271_vm0, %v272_v10, %v273_v11  ;;  %v280_v19 = vrot.slane %v2169_v14, 1  ;;  %v275_v20 = vrot.slane %v2172_v15, 1  ;;  %v2200_v26 = vld [vmem:[%s2136_s28 + $0x50] sm:$0xff]  ;;  %v2203_v27 = vld [vmem:[%s2136_s28 + $0x58] sm:$0x3] }
  0x1f   : > { %356 = vrot.lane.b32.xlu1 %v2177_v16, %s2055_s29  ;;  %352 = vrot.lane.b32.xlu0 %v274_v17, %s2055_s29  ;;  %v2187_v21 = vsel %vm271_vm0, %v283_v4, %v285_v18  ;;  %v2206_v28 = vld [vmem:[%s2136_s28 + $0x48] sm:$0xff]  ;;  %v292_v29 = vrot.slane %v2194_v24, 1  ;;  %v293_v30 = vrot.slane %v2197_v25, 1  ;;  %v288_v31 = vrot.slane %v2200_v26, 1  ;;  %v2228_v37 = vld [vmem:[%s2136_s28 + $0x80] sm:$0xff] }
  0x20   : > { %4200 = vst [vmem:[#allocation6_spill] sm:$0xff] %v2187_v21  ;;  %v2190_v22 = vsel %vm271_vm0, %v278_v9, %v280_v19  ;;  %v276_v23 = vsel %vm271_vm0, %v273_v11, %v275_v20  ;;  %v290_v32 = vrot.slane %v2203_v27, 1  ;;  %v287_v33 = vrot.slane %v2206_v28, 1  ;;  %v2231_v38 = vld [vmem:[%s2136_s28 + $0x88] sm:$0x3]  ;;  %v2234_v39 = vld [vmem:[%s2136_s28 + $0x78] sm:$0xff] }
  0x21   : > { %v2219_v34 = vsel %vm271_vm0, %v292_v29, %v293_v30  ;;  %v2237_v40 = vld [vmem:[%s2136_s28 + $0x70] sm:$0x3]  ;;  %v298_v41 = vrot.slane %v2228_v37, 1  ;;  %v300_v42 = vrot.slane %v2231_v38, 1  ;;  %v297_v43 = vrot.slane %v2234_v39, 1  ;;  %v2259_v48 = vld [vmem:[%s2136_s28 + $0xa8] sm:$0xff] }
  0x22   : > { %4201 = vst [vmem:[#allocation7_spill] sm:$0xff] %v2219_v34  ;;  %v2222_v35 = vsel %vm271_vm0, %v288_v31, %v290_v32  ;;  %v2225_v36 = vsel %vm271_vm0, %v287_v33, %v288_v31  ;;  %v295_v44 = vrot.slane %v2237_v40, 1  ;;  %v2262_v49 = vld [vmem:[%s2136_s28 + $0xb0] sm:$0xff]  ;;  %v2265_v50 = vld [vmem:[%s2136_s28 + $0x98] sm:$0xff]  ;;  %v2268_v51 = vld [vmem:[%s2136_s28 + $0xa0] sm:$0x3] }
  0x23   : > { %4202 = vst [vmem:[#allocation8_spill] sm:$0xff] %v2222_v35  ;;  %v2250_v45 = vsel %vm271_vm0, %v298_v41, %v300_v42  ;;  %v2253_v46 = vsel %vm271_vm0, %v297_v43, %v298_v41  ;;  %v2271_v52 = vld [vmem:[%s2136_s28 + $0x90] sm:$0xff]  ;;  %v307_v53 = vrot.slane %v2259_v48, 1  ;;  %v308_v54 = vrot.slane %v2262_v49, 1  ;;  %v2294_v61 = vld [vmem:[%s2136_s28 + $0xc8] sm:$0xff]  ;;  %v2300_v63 = vld [vmem:[%s2136_s28 + $0xc0] sm:$0xff] }
  0x24   : > { %4203 = vst [vmem:[#allocation9_spill] sm:$0xff] %v2225_v36  ;;  %v2256_v47 = vsel %vm271_vm0, %v293_v30, %v295_v44  ;;  %v303_v55 = vrot.slane %v2265_v50, 1  ;;  %v305_v56 = vrot.slane %v2268_v51, 1  ;;  %v302_v57 = vrot.slane %v2271_v52, 1  ;;  %v2297_v62 = vld [vmem:[%s2136_s28 + $0xd0] sm:$0x3] }
  0x25   : > { %4204 = vst [vmem:[#allocation10_spill] sm:$0xff] %v2250_v45  ;;  %v2285_v58 = vsel %vm271_vm0, %v307_v53, %v308_v54  ;;  %v2303_v3 = vld [vmem:[%s2136_s28 + $0xb8] sm:$0x3]  ;;  %v313_v4 = vrot.slane %v2294_v61, 1  ;;  %v315_v6 = vrot.slane %v2297_v62, 1  ;;  %v312_v9 = vrot.slane %v2300_v63, 1 }
  0x26   : > { %362 = vrot.lane.b32.xlu2 %v2187_v21, %s2055_s29  ;;  %4205 = vst [vmem:[#allocation11_spill] sm:$0xff] %v2253_v46  ;;  %v2288_v59 = vsel %vm271_vm0, %v303_v55, %v305_v56  ;;  %v2291_v60 = vsel %vm271_vm0, %v302_v57, %v303_v55  ;;  %v310_v10 = vrot.slane %v2303_v3, 1  ;;  %v2325_v19 = vld [vmem:[%s2136_s28 + $0xf0] sm:$0xff]  ;;  %v2328_v20 = vld [vmem:[%s2136_s28 + $0xf8] sm:$0xff]  ;;  %v2334_v29 = vld [vmem:[%s2136_s28 + $0xe8] sm:$0x3] }
  0x27   : > { %358 = vrot.lane.b32.xlu1 %v2190_v22, %s2055_s29  ;;  %354 = vrot.lane.b32.xlu0 %v276_v23, %s2055_s29  ;;  %4206 = vst [vmem:[#allocation12_spill] sm:$0xff] %v2256_v47  ;;  %v2316_v11 = vsel %vm271_vm0, %v313_v4, %v315_v6  ;;  %v2319_v17 = vsel %vm271_vm0, %v312_v9, %v313_v4  ;;  %v2331_v23 = vld [vmem:[%s2136_s28 + $0xe0] sm:$0xff]  ;;  %v2337_v30 = vld [vmem:[%s2136_s28 + $0xd8] sm:$0xff]  ;;  %v322_v31 = vrot.slane %v2325_v19, 1  ;;  %v323_v32 = vrot.slane %v2328_v20, 1 }
  0x28   : > { %4207 = vst [vmem:[#allocation13_spill] sm:$0xff] %v2285_v58  ;;  %v2322_v18 = vsel %vm271_vm0, %v308_v54, %v310_v10  ;;  %v318_v33 = vrot.slane %v2331_v23, 1  ;;  %v320_v41 = vrot.slane %v2334_v29, 1  ;;  %v317_v42 = vrot.slane %v2337_v30, 1  ;;  %v2360_v54 = vld [vmem:[%s2136_s28 + $0x110] sm:$0xff]  ;;  %v2366_v56 = vld [vmem:[%s2136_s28 + $0x108] sm:$0xff] }
  0x29   : > { %4208 = vst [vmem:[#allocation14_spill] sm:$0xff] %v2288_v59  ;;  %v2351_v43 = vsel %vm271_vm0, %v322_v31, %v323_v32  ;;  %v2363_v55 = vld [vmem:[%s2136_s28 + $0x118] sm:$0x3]  ;;  %v2369_v57 = vld [vmem:[%s2136_s28 + $0x100] sm:$0x3]  ;;  %v328_v4 = vrot.slane %v2360_v54, 1 }
  0x2a   : > { %4209 = vst [vmem:[#allocation15_spill] sm:$0xff] %v2291_v60  ;;  %v2354_v44 = vsel %vm271_vm0, %v318_v33, %v320_v41  ;;  %v2357_v53 = vsel %vm271_vm0, %v317_v42, %v318_v33  ;;  %v330_v6 = vrot.slane %v2363_v55, 1  ;;  %v327_v9 = vrot.slane %v2366_v56, 1  ;;  %v2391_v42 = vld [vmem:[%s2136_s28 + $0x138] sm:$0xff] }
  0x2b   : > { %4210 = vst [vmem:[#allocation16_spill] sm:$0xff] %v2316_v11  ;;  %v325_v10 = vrot.slane %v2369_v57, 1 }
  0x2c   : > { %4211 = vst [vmem:[#allocation17_spill] sm:$0xff] %v2319_v17  ;;  %v2382_v31 = vsel %vm271_vm0, %v328_v4, %v330_v6  ;;  %v2385_v33 = vsel %vm271_vm0, %v327_v9, %v328_v4  ;;  %v2403_v6 = vld [vmem:[%s2136_s28 + $0x120] sm:$0xff] }
  0x2d   : > { %4212 = vst [vmem:[#allocation18_spill] sm:$0xff] %v2322_v18  ;;  %v2388_v41 = vsel %vm271_vm0, %v323_v32, %v325_v10  ;;  %v337_v32 = vrot.slane %v2391_v42, 1 }
  0x2e   : > { %368 = vrot.lane.b32.xlu2 %v2219_v34, %s2055_s29  ;;  %4213 = vst [vmem:[#allocation19_spill] sm:$0xff] %v2351_v43  ;;  %v2463_v34 = vld [vmem:[%s2136_s28 + $0x168] sm:$0xff] }
  0x2f   : > { %366 = vrot.lane.b32.xlu1 %v2222_v35, %s2055_s29  ;;  %364 = vrot.lane.b32.xlu0 %v2225_v36, %s2055_s29  ;;  %4214 = vst [vmem:[#allocation20_spill] sm:$0xff] %v2354_v44 }
  0x30   : > { %4215 = vst [vmem:[#allocation21_spill] sm:$0xff] %v2357_v53 }
  0x31   : > { %4216 = vst [vmem:[#allocation22_spill] sm:$0xff] %v2382_v31 }
  0x32   : > { %4217 = vst [vmem:[#allocation23_spill] sm:$0xff] %v2385_v33 }
  0x33   : > { %4218 = vst [vmem:[#allocation24_spill] sm:$0xff] %v2388_v41 }
  0x34   : > { %4227 = vst [vmem:[#allocation33_spill] sm:$0xff] %v2463_v34 }
  0x36   : > { %374 = vrot.lane.b32.xlu2 %v2250_v45, %s2055_s29  ;;  %v2435_v45 = vld [vmem:[%s2136_s28 + $0x148] sm:$0x3] }
  0x37   : > { %372 = vrot.lane.b32.xlu1 %v2253_v46, %s2055_s29  ;;  %370 = vrot.lane.b32.xlu0 %v2256_v47, %s2055_s29 }
  0x3e   : > { %380 = vrot.lane.b32.xlu2 %v2285_v58, %s2055_s29 }
  0x3f   : > { %378 = vrot.lane.b32.xlu1 %v2288_v59, %s2055_s29  ;;  %376 = vrot.lane.b32.xlu0 %v2291_v60, %s2055_s29 }
  0x46   : > { %386 = vrot.lane.b32.xlu2 %v2316_v11, %s2055_s29  ;;  %v2397_v11 = vld [vmem:[%s2136_s28 + $0x128] sm:$0xff] }
  0x47   : > { %384 = vrot.lane.b32.xlu1 %v2319_v17, %s2055_s29  ;;  %382 = vrot.lane.b32.xlu0 %v2322_v18, %s2055_s29  ;;  %v333_v9 = vrot.slane %v2397_v11, 1  ;;  %v2429_v18 = vld [vmem:[%s2136_s28 + $0x160] sm:$0x3]  ;;  %v2432_v17 = vld [vmem:[%s2136_s28 + $0x150] sm:$0xff] }
  0x4e   : > { %392 = vrot.lane.b32.xlu2 %v2351_v43, %s2055_s29  ;;  %v2394_v43 = vld [vmem:[%s2136_s28 + $0x140] sm:$0xff] }
  0x4f   : > { %390 = vrot.lane.b32.xlu1 %v2354_v44, %s2055_s29  ;;  %388 = vrot.lane.b32.xlu0 %v2357_v53, %s2055_s29  ;;  %4219 = vst [vmem:[#allocation25_spill] sm:$0xff] %v2394_v43  ;;  %v2400_v53 = vld [vmem:[%s2136_s28 + $0x130] sm:$0x3]  ;;  %v338_v4 = vrot.slane %v2394_v43, 1  ;;  %v332_v44 = vrot.slane %v2403_v6, 1 }
  0x50   : > { %v335_v10 = vrot.slane %v2400_v53, 1 }
  0x51   : > { %v2417_v58 = vsel %vm271_vm0, %v337_v32, %v338_v4  ;;  %v345_v32 = vrot.slane %v2429_v18, 1 }
  0x52   : > { %4220 = vst [vmem:[#allocation26_spill] sm:$0xff] %v2417_v58 }
  0x56   : > { %398 = vrot.lane.b32.xlu2 %v2382_v31, %s2055_s29  ;;  %v2420_v31 = vsel %vm271_vm0, %v333_v9, %v335_v10  ;;  %v340_v10 = vrot.slane %v2435_v45, 1 }
  0x57   : > { %396 = vrot.lane.b32.xlu1 %v2385_v33, %s2055_s29  ;;  %394 = vrot.lane.b32.xlu0 %v2388_v41, %s2055_s29  ;;  %4221 = vst [vmem:[#allocation27_spill] sm:$0xff] %v2420_v31  ;;  %v2423_v33 = vsel %vm271_vm0, %v332_v44, %v333_v9  ;;  %v2426_v41 = vld [vmem:[%s2136_s28 + $0x158] sm:$0xff]  ;;  %v342_v9 = vrot.slane %v2432_v17, 1 }
  0x58   : > { %4222 = vst [vmem:[#allocation28_spill] sm:$0xff] %v2423_v33  ;;  %v343_v44 = vrot.slane %v2426_v41, 1 }
  0x5a   : > { %v2448_v60 = vsel %vm271_vm0, %v343_v44, %v345_v32  ;;  %v2451_v59 = vsel %vm271_vm0, %v342_v9, %v343_v44  ;;  %v449_v44 = vrot.slane %v2154_v7, 2  ;;  %v455_v7 = vrot.slane %v2150_v5, 2 }
  0x5b   : > { %4223 = vst [vmem:[#allocation29_spill] sm:$0xff] %v2448_v60 }
  0x5c   : > { %4224 = vst [vmem:[#allocation30_spill] sm:$0xff] %v2451_v59 }
  0x5e   : > { %404 = vrot.lane.b32.xlu2 %v2417_v58, %s2055_s29  ;;  %v2454_v58 = vsel %vm271_vm0, %v338_v4, %v340_v10  ;;  %v450_v4 = vrot.slane %v2157_v8, 2  ;;  %v347_v10 = vrot.slane %v2463_v34, 1  ;;  %v457_v8 = vrot.slane %v2169_v14, 2 }
  0x5f   : > { %402 = vrot.lane.b32.xlu1 %v2420_v31, %s2055_s29  ;;  %400 = vrot.lane.b32.xlu0 %v2423_v33, %s2055_s29  ;;  %4225 = vst [vmem:[#allocation31_spill] sm:$0xff] %v2454_v58  ;;  %v2457_v31 = vld [vmem:[%s2136_s28 + $0x170] sm:$0xff]  ;;  %v2460_v33 = vld [vmem:[%s2136_s28 + $0x178] sm:$0x3]  ;;  %v464_v14 = vrot.slane %v2206_v28, 2 }
  0x60   : > { %4226 = vst [vmem:[#allocation32_spill] sm:$0xff] %v2457_v31  ;;  %v348_v32 = vrot.slane %v2457_v31, 1  ;;  %v350_v9 = vrot.slane %v2460_v33, 1  ;;  %v451_v47 = vsel %vm448_vm1, %v449_v44, %v450_v4  ;;  %v454_v44 = vrot.slane %v2145_v2, 2 }
  0x66   : > { %410 = vrot.lane.b32.xlu2 %v2448_v60, %s2055_s29  ;;  %v2478_v60 = vsel %vm271_vm0, %v348_v32, %v350_v9  ;;  %v452_v9 = vrot.slane %v2172_v15, 2  ;;  %v465_v15 = vrot.slane %v2200_v26, 2 }
  0x67   : > { %408 = vrot.lane.b32.xlu1 %v2451_v59, %s2055_s29  ;;  %406 = vrot.lane.b32.xlu0 %v2454_v58, %s2055_s29  ;;  %4228 = vst [vmem:[#allocation34_spill] sm:$0xff] %v2478_v60  ;;  %v2481_v59 = vsel %vm271_vm0, %v347_v10, %v348_v32  ;;  %v2493_v32 = vsel %vm448_vm1, %v455_v7, %v457_v8  ;;  %v460_v8 = vrot.slane %v2142_v1, 2 }
  0x68   : > { %4229 = vst [vmem:[#allocation35_spill] sm:$0xff] %v2481_v59  ;;  %v2496_v10 = vsel %vm448_vm1, %v454_v44, %v455_v7  ;;  %v462_v7 = vrot.slane %v2163_v12, 2  ;;  %v2512_v44 = vsel %vm448_vm1, %v464_v14, %v465_v15  ;;  %v470_v12 = vrot.slane %v2197_v25, 2 }
  0x69   : > { %4230 = vst [vmem:[#allocation36_spill] sm:$0xff] %v2493_v32  ;;  %v472_v14 = vrot.slane %v2237_v40, 2  ;;  %v480_v40 = vrot.slane %v2265_v50, 2 }
  0x6a   : > { %4232 = vst [vmem:[#allocation38_spill] sm:$0xff] %v2512_v44 }
  0x6e   : > { %529 = vrot.lane.b32.xlu2 %v451_v47, %s2056_s30  ;;  %v453_v47 = vsel %vm448_vm1, %v450_v4, %v452_v9  ;;  %v459_v4 = vrot.slane %v2139_v0, 2  ;;  %v2515_v9 = vsel %vm448_vm1, %v460_v8, %v462_v7  ;;  %v469_v7 = vrot.slane %v2194_v24, 2 }
  0x6f   : > { %414 = vrot.lane.b32.xlu1 %v2478_v60, %s2055_s29  ;;  %412 = vrot.lane.b32.xlu0 %v2481_v59, %s2055_s29  ;;  %4233 = vst [vmem:[#allocation39_spill] sm:$0xff] %v2515_v9 }
  0x76   : > { %535 = vrot.lane.b32.xlu2 %v2493_v32, %s2056_s30 }
  0x77   : > { %533 = vrot.lane.b32.xlu1 %v2496_v10, %s2056_s30  ;;  %531 = vrot.lane.b32.xlu0 %v453_v47, %s2056_s30  ;;  %v2518_v47 = vsel %vm448_vm1, %v459_v4, %v460_v8  ;;  %v467_v8 = vrot.slane %v2203_v27, 2  ;;  %v2533_v4 = vsel %vm448_vm1, %v470_v12, %v472_v14  ;;  %v479_v27 = vrot.slane %v2271_v52, 2 }
  0x78   : > { %v2506_v59 = vpop.permute.xlu2 %360  ;;  %4234 = vst [vmem:[#allocation40_spill] sm:$0xff] %v2518_v47 }
  0x79   : > { %4231 = vst [vmem:[#allocation37_spill] sm:$0xff] %v2506_v59  ;;  %v2539_v32 = vsel %vm448_vm1, %v465_v15, %v467_v8  ;;  %v477_v15 = vrot.slane %v2231_v38, 2  ;;  %v2555_v8 = vsel %vm448_vm1, %v479_v27, %v480_v40  ;;  %v485_v38 = vrot.slane %v2262_v49, 2 }
  0x7a   : > { %4236 = vst [vmem:[#allocation42_spill] sm:$0xff] %v2533_v4  ;;  %v487_v27 = vrot.slane %v2303_v3, 2  ;;  %v495_v3 = vrot.slane %v2331_v23, 2 }
  0x7b   : > { %4238 = vst [vmem:[#allocation44_spill] sm:$0xff] %v2539_v32 }
  0x7c   : > { %4240 = vst [vmem:[#allocation46_spill] sm:$0xff] %v2555_v8 }
  0x7e   : > { %541 = vrot.lane.b32.xlu2 %v2512_v44, %s2056_s30  ;;  %v2536_v44 = vsel %vm448_vm1, %v469_v7, %v470_v12  ;;  %v475_v12 = vrot.slane %v2228_v37, 2  ;;  %v474_v7 = vrot.slane %v2234_v39, 2 }
  0x7f   : > { %539 = vrot.lane.b32.xlu1 %v2515_v9, %s2056_s30  ;;  %537 = vrot.lane.b32.xlu0 %v2518_v47, %s2056_s30  ;;  %4237 = vst [vmem:[#allocation43_spill] sm:$0xff] %v2536_v44 }
  0x80   : > { %v2528_v59 = vpop.permute.xlu2 %362 }
  0x81   : > { %4235 = vst [vmem:[#allocation41_spill] sm:$0xff] %v2528_v59  ;;  %v2558_v59 = vsel %vm448_vm1, %v475_v12, %v477_v15  ;;  %v484_v15 = vrot.slane %v2259_v48, 2 }
  0x82   : > { %4241 = vst [vmem:[#allocation47_spill] sm:$0xff] %v2558_v59 }
  0x86   : > { %547 = vrot.lane.b32.xlu2 %v2533_v4, %s2056_s30  ;;  %v2561_v4 = vsel %vm448_vm1, %v474_v7, %v475_v12  ;;  %v482_v12 = vrot.slane %v2268_v51, 2  ;;  %v494_v51 = vrot.slane %v2337_v30, 2 }
  0x87   : > { %545 = vrot.lane.b32.xlu1 %v2536_v44, %s2056_s30  ;;  %543 = vrot.lane.b32.xlu0 %v2539_v32, %s2056_s30  ;;  %4242 = vst [vmem:[#allocation48_spill] sm:$0xff] %v2561_v4 }
  0x88   : > { %v2549_v14 = vpop.permute.xlu2 %368 }
  0x89   : > { %4239 = vst [vmem:[#allocation45_spill] sm:$0xff] %v2549_v14 }
  0x8e   : > { %553 = vrot.lane.b32.xlu2 %v2555_v8, %s2056_s30  ;;  %v2580_v8 = vsel %vm448_vm1, %v485_v38, %v487_v27 }
  0x8f   : > { %551 = vrot.lane.b32.xlu1 %v2558_v59, %s2056_s30  ;;  %549 = vrot.lane.b32.xlu0 %v2561_v4, %s2056_s30  ;;  %4246 = vst [vmem:[#allocation52_spill] sm:$0xff] %v2580_v8  ;;  %v2583_v59 = vsel %vm448_vm1, %v484_v15, %v485_v38  ;;  %v2586_v4 = vsel %vm448_vm1, %v480_v40, %v482_v12  ;;  %v490_v38 = vrot.slane %v2294_v61, 2  ;;  %v492_v40 = vrot.slane %v2297_v62, 2 }
  0x90   : > { %v2571_v14 = vpop.permute.xlu2 %374  ;;  %4247 = vst [vmem:[#allocation53_spill] sm:$0xff] %v2583_v59  ;;  %v489_v15 = vrot.slane %v2300_v63, 2  ;;  %v500_v62 = vrot.slane %v2328_v20, 2 }
  0x91   : > { %4243 = vst [vmem:[#allocation49_spill] sm:$0xff] %v2571_v14  ;;  %v2575_v7 = vpop.permute.xlu1 %356  ;;  %v2577_v32 = vpop.permute.xlu0 %352 }
  0x92   : > { %4244 = vst [vmem:[#allocation50_spill] sm:$0xff] %v2575_v7  ;;  %v2606_v7 = vsel %vm448_vm1, %v494_v51, %v495_v3  ;;  %v502_v51 = vrot.slane %v2369_v57, 2  ;;  %v510_v57 = vrot.slane %v2397_v11, 2 }
  0x93   : > { %4245 = vst [vmem:[#allocation51_spill] sm:$0xff] %v2577_v32  ;;  %v2609_v32 = vsel %vm448_vm1, %v490_v38, %v492_v40  ;;  %v499_v40 = vrot.slane %v2325_v19, 2 }
  0x94   : > { %4248 = vst [vmem:[#allocation54_spill] sm:$0xff] %v2586_v4 }
  0x95   : > { %4252 = vst [vmem:[#allocation58_spill] sm:$0xff] %v2606_v7 }
  0x96   : > { %559 = vrot.lane.b32.xlu2 %v2580_v8, %s2056_s30  ;;  %4253 = vst [vmem:[#allocation59_spill] sm:$0xff] %v2609_v32  ;;  %v2612_v8 = vsel %vm448_vm1, %v489_v15, %v490_v38  ;;  %v497_v38 = vrot.slane %v2334_v29, 2  ;;  %v509_v29 = vrot.slane %v2403_v6, 2 }
  0x97   : > { %557 = vrot.lane.b32.xlu1 %v2583_v59, %s2056_s30  ;;  %555 = vrot.lane.b32.xlu0 %v2586_v4, %s2056_s30  ;;  %4254 = vst [vmem:[#allocation60_spill] sm:$0xff] %v2612_v8 }
  0x98   : > { %v2596_v27 = vpop.permute.xlu2 %380 }
  0x99   : > { %4249 = vst [vmem:[#allocation55_spill] sm:$0xff] %v2596_v27  ;;  %v2601_v12 = vpop.permute.xlu1 %358  ;;  %v2603_v14 = vpop.permute.xlu0 %354 }
  0x9a   : > { %4250 = vst [vmem:[#allocation56_spill] sm:$0xff] %v2601_v12 }
  0x9b   : > { %4251 = vst [vmem:[#allocation57_spill] sm:$0xff] %v2603_v14  ;;  %v2631_v14 = vsel %vm448_vm1, %v500_v62, %v502_v51 }
  0x9c   : > { %4258 = vst [vmem:[#allocation64_spill] sm:$0xff] %v2631_v14 }
  0x9e   : > { %565 = vrot.lane.b32.xlu2 %v2606_v7, %s2056_s30  ;;  %v2634_v7 = vsel %vm448_vm1, %v499_v40, %v500_v62  ;;  %v505_v62 = vrot.slane %v2360_v54, 2  ;;  %v504_v40 = vrot.slane %v2366_v56, 2 }
  0x9f   : > { %563 = vrot.lane.b32.xlu1 %v2609_v32, %s2056_s30  ;;  %561 = vrot.lane.b32.xlu0 %v2612_v8, %s2056_s30  ;;  %4259 = vst [vmem:[#allocation65_spill] sm:$0xff] %v2634_v7  ;;  %v2637_v8 = vsel %vm448_vm1, %v495_v3, %v497_v38  ;;  %v507_v3 = vrot.slane %v2363_v55, 2  ;;  %v515_v55 = vrot.slane %v2394_v43, 2 }
  0xa0   : > { %v2622_v27 = vpop.permute.xlu2 %386  ;;  %4260 = vst [vmem:[#allocation66_spill] sm:$0xff] %v2637_v8 }
  0xa1   : > { %4255 = vst [vmem:[#allocation61_spill] sm:$0xff] %v2622_v27  ;;  %v2626_v15 = vpop.permute.xlu1 %366  ;;  %v2628_v12 = vpop.permute.xlu0 %364  ;;  %v2660_v27 = vsel %vm448_vm1, %v505_v62, %v507_v3  ;;  %v514_v3 = vrot.slane %v2391_v42, 2 }
  0xa2   : > { %4256 = vst [vmem:[#allocation62_spill] sm:$0xff] %v2626_v15  ;;  %v2657_v15 = vsel %vm448_vm1, %v509_v29, %v510_v57  ;;  %v517_v29 = vrot.slane %v2435_v45, 2  ;;  %v524_v45 = vrot.slane %v2463_v34, 2 }
  0xa3   : > { %4257 = vst [vmem:[#allocation63_spill] sm:$0xff] %v2628_v12 }
  0xa4   : > { %4264 = vst [vmem:[#allocation70_spill] sm:$0xff] %v2657_v15 }
  0xa5   : > { %4265 = vst [vmem:[#allocation71_spill] sm:$0xff] %v2660_v27 }
  0xa6   : > { %571 = vrot.lane.b32.xlu2 %v2631_v14, %s2056_s30  ;;  %v2663_v14 = vsel %vm448_vm1, %v504_v40, %v505_v62  ;;  %v512_v62 = vrot.slane %v2400_v53, 2  ;;  %v525_v53 = vrot.slane %v2457_v31, 2 }
  0xa7   : > { %569 = vrot.lane.b32.xlu1 %v2634_v7, %s2056_s30  ;;  %567 = vrot.lane.b32.xlu0 %v2637_v8, %s2056_s30  ;;  %4266 = vst [vmem:[#allocation72_spill] sm:$0xff] %v2663_v14 }
  0xa8   : > { %v2647_v51 = vpop.permute.xlu2 %392 }
  0xa9   : > { %4261 = vst [vmem:[#allocation67_spill] sm:$0xff] %v2647_v51  ;;  %v2652_v38 = vpop.permute.xlu1 %372  ;;  %v2654_v12 = vpop.permute.xlu0 %370  ;;  %v2682_v51 = vsel %vm448_vm1, %v515_v55, %v517_v29 }
  0xaa   : > { %4262 = vst [vmem:[#allocation68_spill] sm:$0xff] %v2652_v38 }
  0xab   : > { %4263 = vst [vmem:[#allocation69_spill] sm:$0xff] %v2654_v12 }
  0xac   : > { %4270 = vst [vmem:[#allocation76_spill] sm:$0xff] %v2682_v51 }
  0xae   : > { %577 = vrot.lane.b32.xlu2 %v2657_v15, %s2056_s30  ;;  %v2685_v15 = vsel %vm448_vm1, %v514_v3, %v515_v55  ;;  %v520_v55 = vrot.slane %v2426_v41, 2  ;;  %v519_v3 = vrot.slane %v2432_v17, 2 }
  0xaf   : > { %575 = vrot.lane.b32.xlu1 %v2660_v27, %s2056_s30  ;;  %573 = vrot.lane.b32.xlu0 %v2663_v14, %s2056_s30  ;;  %4271 = vst [vmem:[#allocation77_spill] sm:$0xff] %v2685_v15  ;;  %v2688_v14 = vsel %vm448_vm1, %v510_v57, %v512_v62  ;;  %v522_v57 = vrot.slane %v2429_v18, 2 }
  0xb0   : > { %v2673_v12 = vpop.permute.xlu2 %398  ;;  %4272 = vst [vmem:[#allocation78_spill] sm:$0xff] %v2688_v14 }
  0xb1   : > { %4267 = vst [vmem:[#allocation73_spill] sm:$0xff] %v2673_v12  ;;  %v2677_v40 = vpop.permute.xlu1 %378  ;;  %v2679_v38 = vpop.permute.xlu0 %376  ;;  %v2711_v12 = vsel %vm448_vm1, %v520_v55, %v522_v57 }
  0xb2   : > { %4268 = vst [vmem:[#allocation74_spill] sm:$0xff] %v2677_v40  ;;  %v2708_v40 = vsel %vm448_vm1, %v524_v45, %v525_v53  ;;  %v527_v45 = vrot.slane %v2460_v33, 2 }
  0xb3   : > { %4269 = vst [vmem:[#allocation75_spill] sm:$0xff] %v2679_v38 }
  0xb4   : > { %4275 = vst [vmem:[#allocation81_spill] sm:$0xff] %v2711_v12 }
  0xb6   : > { %583 = vrot.lane.b32.xlu2 %v2682_v51, %s2056_s30  ;;  %v2714_v51 = vsel %vm448_vm1, %v519_v3, %v520_v55  ;;  %v2730_v55 = vsel %vm448_vm1, %v525_v53, %v527_v45 }
  0xb7   : > { %581 = vrot.lane.b32.xlu1 %v2685_v15, %s2056_s30  ;;  %579 = vrot.lane.b32.xlu0 %v2688_v14, %s2056_s30  ;;  %4276 = vst [vmem:[#allocation82_spill] sm:$0xff] %v2714_v51 }
  0xb8   : > { %v2698_v29 = vpop.permute.xlu2 %404 }
  0xb9   : > { %4273 = vst [vmem:[#allocation79_spill] sm:$0xff] %v2698_v29  ;;  %v2703_v62 = vpop.permute.xlu1 %384  ;;  %v2705_v38 = vpop.permute.xlu0 %382 }
  0xba   : > { %4274 = vst [vmem:[#allocation80_spill] sm:$0xff] %v2703_v62 }
  0xbe   : > { %589 = vrot.lane.b32.xlu2 %v2708_v40, %s2056_s30 }
  0xbf   : > { %587 = vrot.lane.b32.xlu1 %v2711_v12, %s2056_s30  ;;  %585 = vrot.lane.b32.xlu0 %v2714_v51, %s2056_s30 }
  0xc0   : > { %v2722_v18 = vpop.permute.xlu2 %410 }
  0xc1   : > { %4277 = vst [vmem:[#allocation83_spill] sm:$0xff] %v2722_v18  ;;  %v2725_v29 = vpop.permute.xlu1 %390  ;;  %v2727_v57 = vpop.permute.xlu0 %388 }
  0xc2   : > { %4278 = vst [vmem:[#allocation84_spill] sm:$0xff] %v2725_v29 }
  0xc6   : > { %629 = vrot.lane.b32.xlu2 %v2150_v5, %s2057_s4 }
  0xc7   : > { %627 = vrot.lane.b32.xlu1 %v2145_v2, %s2057_s4  ;;  %591 = vrot.lane.b32.xlu0 %v2730_v55, %s2056_s30 }
  0xc8   : > { %v2738_v3 = vpop.permute.xlu2 %529 }
  0xc9   : > { %4279 = vst [vmem:[#allocation85_spill] sm:$0xff] %v2738_v3  ;;  %v2740_v33 = vpop.permute.xlu1 %396  ;;  %v2742_v18 = vpop.permute.xlu0 %394 }
  0xca   : > { %4280 = vst [vmem:[#allocation86_spill] sm:$0xff] %v2740_v33 }
  0xce   : > { %635 = vrot.lane.b32.xlu2 %v2206_v28, %s2057_s4 }
  0xcf   : > { %633 = vrot.lane.b32.xlu1 %v2142_v1, %s2057_s4  ;;  %631 = vrot.lane.b32.xlu0 %v2139_v0, %s2057_s4 }
  0xd0   : > { %v2750_v5 = vpop.permute.xlu2 %535 }
  0xd1   : > { %4281 = vst [vmem:[#allocation87_spill] sm:$0xff] %v2750_v5  ;;  %v2752_v2 = vpop.permute.xlu1 %402  ;;  %v2754_v53 = vpop.permute.xlu0 %400 }
  0xd2   : > { %4282 = vst [vmem:[#allocation88_spill] sm:$0xff] %v2752_v2 }
  0xd3   : > { %4283 = vst [vmem:[#allocation89_spill] sm:$0xff] %v2754_v53 }
  0xd6   : > { %641 = vrot.lane.b32.xlu2 %v2197_v25, %s2057_s4 }
  0xd7   : > { %639 = vrot.lane.b32.xlu1 %v2194_v24, %s2057_s4  ;;  %637 = vrot.lane.b32.xlu0 %v2200_v26, %s2057_s4 }
  0xd8   : > { %v2762_v45 = vpop.permute.xlu2 %541 }
  0xd9   : > { %4284 = vst [vmem:[#allocation90_spill] sm:$0xff] %v2762_v45  ;;  %v2764_v3 = vpop.permute.xlu1 %408  ;;  %v2766_v33 = vpop.permute.xlu0 %406 }
  0xda   : > { %4285 = vst [vmem:[#allocation91_spill] sm:$0xff] %v2764_v3 }
  0xdb   : > { %4286 = vst [vmem:[#allocation92_spill] sm:$0xff] %v2766_v33 }
  0xde   : > { %647 = vrot.lane.b32.xlu2 %v2271_v52, %s2057_s4 }
  0xdf   : > { %645 = vrot.lane.b32.xlu1 %v2228_v37, %s2057_s4  ;;  %643 = vrot.lane.b32.xlu0 %v2234_v39, %s2057_s4 }
  0xe0   : > { %v2774_v5 = vpop.permute.xlu2 %547 }
  0xe1   : > { %4287 = vst [vmem:[#allocation93_spill] sm:$0xff] %v2774_v5  ;;  %v2776_v2 = vpop.permute.xlu1 %414  ;;  %v2778_v29 = vpop.permute.xlu0 %412 }
  0xe2   : > { %4288 = vst [vmem:[#allocation94_spill] sm:$0xff] %v2776_v2 }
  0xe3   : > { %4289 = vst [vmem:[#allocation95_spill] sm:$0xff] %v2778_v29 }
  0xe6   : > { %653 = vrot.lane.b32.xlu2 %v2262_v49, %s2057_s4 }
  0xe7   : > { %651 = vrot.lane.b32.xlu1 %v2259_v48, %s2057_s4  ;;  %649 = vrot.lane.b32.xlu0 %v2265_v50, %s2057_s4 }
  0xe8   : > { %v2786_v45 = vpop.permute.xlu2 %553 }
  0xe9   : > { %4290 = vst [vmem:[#allocation96_spill] sm:$0xff] %v2786_v45  ;;  %v2788_v3 = vpop.permute.xlu1 %533  ;;  %v2790_v62 = vpop.permute.xlu0 %531 }
  0xea   : > { %4291 = vst [vmem:[#allocation97_spill] sm:$0xff] %v2788_v3 }
  0xeb   : > { %4292 = vst [vmem:[#allocation98_spill] sm:$0xff] %v2790_v62 }
  0xee   : > { %659 = vrot.lane.b32.xlu2 %v2337_v30, %s2057_s4 }
  0xef   : > { %657 = vrot.lane.b32.xlu1 %v2294_v61, %s2057_s4  ;;  %655 = vrot.lane.b32.xlu0 %v2300_v63, %s2057_s4 }
  0xf0   : > { %v2798_v5 = vpop.permute.xlu2 %559 }
  0xf1   : > { %v2800_v2 = vpop.permute.xlu1 %539  ;;  %v2802_v29 = vpop.permute.xlu0 %537 }
  0xf2   : > { %4293 = vst [vmem:[#allocation99_spill] sm:$0xff] %v2800_v2 }
  0xf3   : > { %4294 = vst [vmem:[#allocation100_spill] sm:$0xff] %v2802_v29 }
  0xf6   : > { %665 = vrot.lane.b32.xlu2 %v2328_v20, %s2057_s4 }
  0xf7   : > { %663 = vrot.lane.b32.xlu1 %v2325_v19, %s2057_s4  ;;  %661 = vrot.lane.b32.xlu0 %v2331_v23, %s2057_s4 }
  0xf8   : > { %v2810_v45 = vpop.permute.xlu2 %565 }
  0xf9   : > { %v2812_v3 = vpop.permute.xlu1 %545  ;;  %v2814_v62 = vpop.permute.xlu0 %543 }
  0xfa   : > { %4295 = vst [vmem:[#allocation101_spill] sm:$0xff] %v2812_v3 }
  0xfb   : > { %4296 = vst [vmem:[#allocation102_spill] sm:$0xff] %v2814_v62 }
  0xfe   : > { %671 = vrot.lane.b32.xlu2 %v2403_v6, %s2057_s4 }
  0xff   : > { %669 = vrot.lane.b32.xlu1 %v2360_v54, %s2057_s4  ;;  %667 = vrot.lane.b32.xlu0 %v2366_v56, %s2057_s4 }
 0x100   : > { %v2822_v2 = vpop.permute.xlu2 %571 }
 0x101   : > { %v2824_v29 = vpop.permute.xlu1 %551  ;;  %v2826_v33 = vpop.permute.xlu0 %549 }
 0x102   : > { %4297 = vst [vmem:[#allocation103_spill] sm:$0xff] %v2824_v29 }
 0x103   : > { %4298 = vst [vmem:[#allocation104_spill] sm:$0xff] %v2826_v33 }
 0x106   : > { %677 = vrot.lane.b32.xlu2 %v2394_v43, %s2057_s4 }
 0x107   : > { %675 = vrot.lane.b32.xlu1 %v2391_v42, %s2057_s4  ;;  %673 = vrot.lane.b32.xlu0 %v2397_v11, %s2057_s4 }
 0x108   : > { %v2834_v3 = vpop.permute.xlu2 %577 }
 0x109   : > { %4299 = vst [vmem:[#allocation105_spill] sm:$0xff] %v2834_v3  ;;  %v2836_v62 = vpop.permute.xlu1 %557  ;;  %v2838_v53 = vpop.permute.xlu0 %555  ;;  %v2853_v3 = vld [vmem:[%s2136_s28 + $0x188] sm:$0xff] }
 0x10a   : > { %4300 = vst [vmem:[#allocation106_spill] sm:$0xff] %v2836_v62  ;;  %v2856_v62 = vld [vmem:[%s2136_s28 + $0x180] sm:$0xff] }
 0x10b   : > { %4301 = vst [vmem:[#allocation107_spill] sm:$0xff] %v2838_v53 }
 0x10e   : > { %683 = vrot.lane.b32.xlu2 %v2463_v34, %s2057_s4 }
 0x10f   : > { %681 = vrot.lane.b32.xlu1 %v2426_v41, %s2057_s4  ;;  %679 = vrot.lane.b32.xlu0 %v2432_v17, %s2057_s4 }
 0x110   : > { %v2846_v29 = vpop.permute.xlu2 %583 }
 0x111   : > { %4302 = vst [vmem:[#allocation108_spill] sm:$0xff] %v2846_v29  ;;  %v2848_v33 = vpop.permute.xlu1 %563  ;;  %v2850_v43 = vpop.permute.xlu0 %561 }
 0x112   : > { %4303 = vst [vmem:[#allocation109_spill] sm:$0xff] %v2848_v33 }
 0x113   : > { %4304 = vst [vmem:[#allocation110_spill] sm:$0xff] %v2850_v43 }
 0x116   : > { %689 = vrot.lane.b32.xlu2 %v2853_v3, %s2057_s4 }
 0x117   : > { %687 = vrot.lane.b32.xlu1 %v2856_v62, %s2057_s4  ;;  %685 = vrot.lane.b32.xlu0 %v2457_v31, %s2057_s4  ;;  %s161_s4 = sand.u32 1, %s2045_s13  }
 0x118   : > { %v2864_v53 = vpop.permute.xlu2 %589  ;;  %s1781_s19 = scalar_lea.sflag [#allocation3], %s161_s4 }
 0x119   : > { %v2866_v34 = vpop.permute.xlu1 %569  ;;  %v2868_v33 = vpop.permute.xlu0 %567 }
 0x11a   : > { %4305 = vst [vmem:[#allocation111_spill] sm:$0xff] %v2868_v33 }
 0x11e   : > { %733 = vrot.lane.b32.xlu2 %v2166_v13, %s2058_s5 }
 0x11f   : > { %731 = vrot.lane.b32.xlu1 %v2190_v22, %s2058_s5  ;;  %729 = vrot.lane.b32.xlu0 %v2177_v16, %s2058_s5 }
 0x120   : > { %v2876_v43 = vpop.permute.xlu2 %629 }
 0x121   : > { %4306 = vst [vmem:[#allocation112_spill] sm:$0xff] %v2876_v43  ;;  %v2878_v29 = vpop.permute.xlu1 %575  ;;  %v2880_v31 = vpop.permute.xlu0 %573 }
 0x122   : > { %4307 = vst [vmem:[#allocation113_spill] sm:$0xff] %v2878_v29 }
 0x123   : > { %4308 = vst [vmem:[#allocation114_spill] sm:$0xff] %v2880_v31  ;;  %v4312_v31 = vld [vmem:[#allocation12_spill] sm:$0xff] }
 0x126   : > { %739 = vrot.lane.b32.xlu2 %v2222_v35, %s2058_s5  ;;  %v4313_v35 = vld [vmem:[#allocation7_spill] sm:$0xff] }
 0x127   : > { %737 = vrot.lane.b32.xlu1 %v2225_v36, %s2058_s5  ;;  %735 = vrot.lane.b32.xlu0 %v2187_v21, %s2058_s5 }
 0x128   : > { %v2888_v13 = vpop.permute.xlu2 %635 }
 0x129   : > { %4309 = vst [vmem:[#allocation115_spill] sm:$0xff] %v2888_v13  ;;  %v2890_v22 = vpop.permute.xlu1 %581  ;;  %v2892_v16 = vpop.permute.xlu0 %579  ;;  %v4317_v13 = vld [vmem:[#allocation14_spill] sm:$0xff] }
 0x12a   : > { %4310 = vst [vmem:[#allocation116_spill] sm:$0xff] %v2890_v22 }
 0x12b   : > { %4311 = vst [vmem:[#allocation117_spill] sm:$0xff] %v2892_v16  ;;  %v4318_v16 = vld [vmem:[#allocation15_spill] sm:$0xff] }
 0x12e   : > { %745 = vrot.lane.b32.xlu2 %v2253_v46, %s2058_s5  ;;  %v4319_v46 = vld [vmem:[#allocation10_spill] sm:$0xff] }
 0x12f   : > { %743 = vrot.lane.b32.xlu1 %v4312_v31, %s2058_s5  ;;  %741 = vrot.lane.b32.xlu0 %v4313_v35, %s2058_s5 }
 0x130   : > { %v2900_v29 = vpop.permute.xlu2 %641 }
 0x131   : > { %4314 = vst [vmem:[#allocation118_spill] sm:$0xff] %v2900_v29  ;;  %v2902_v36 = vpop.permute.xlu1 %587  ;;  %v2904_v21 = vpop.permute.xlu0 %585  ;;  %v4323_v29 = vld [vmem:[#allocation17_spill] sm:$0xff] }
 0x132   : > { %4315 = vst [vmem:[#allocation119_spill] sm:$0xff] %v2902_v36 }
 0x133   : > { %4316 = vst [vmem:[#allocation120_spill] sm:$0xff] %v2904_v21  ;;  %v4324_v21 = vld [vmem:[#allocation18_spill] sm:$0xff] }
 0x136   : > { %751 = vrot.lane.b32.xlu2 %v4317_v13, %s2058_s5  ;;  %v4325_v13 = vld [vmem:[#allocation13_spill] sm:$0xff] }
 0x137   : > { %749 = vrot.lane.b32.xlu1 %v4318_v16, %s2058_s5  ;;  %747 = vrot.lane.b32.xlu0 %v4319_v46, %s2058_s5 }
 0x138   : > { %v2912_v22 = vpop.permute.xlu2 %647 }
 0x139   : > { %4320 = vst [vmem:[#allocation121_spill] sm:$0xff] %v2912_v22  ;;  %v2914_v31 = vpop.permute.xlu1 %627  ;;  %v2916_v35 = vpop.permute.xlu0 %591  ;;  %v4329_v22 = vld [vmem:[#allocation20_spill] sm:$0xff] }
 0x13a   : > { %4321 = vst [vmem:[#allocation122_spill] sm:$0xff] %v2914_v31 }
 0x13b   : > { %4322 = vst [vmem:[#allocation123_spill] sm:$0xff] %v2916_v35  ;;  %v4330_v35 = vld [vmem:[#allocation21_spill] sm:$0xff] }
 0x13e   : > { %757 = vrot.lane.b32.xlu2 %v4323_v29, %s2058_s5  ;;  %v4331_v29 = vld [vmem:[#allocation16_spill] sm:$0xff] }
 0x13f   : > { %755 = vrot.lane.b32.xlu1 %v4324_v21, %s2058_s5  ;;  %753 = vrot.lane.b32.xlu0 %v4325_v13, %s2058_s5 }
 0x140   : > { %v2924_v36 = vpop.permute.xlu2 %653 }
 0x141   : > { %4326 = vst [vmem:[#allocation124_spill] sm:$0xff] %v2924_v36  ;;  %v2926_v16 = vpop.permute.xlu1 %633  ;;  %v2928_v46 = vpop.permute.xlu0 %631  ;;  %v4334_v36 = vld [vmem:[#allocation23_spill] sm:$0xff] }
 0x142   : > { %4327 = vst [vmem:[#allocation125_spill] sm:$0xff] %v2926_v16 }
 0x143   : > { %4328 = vst [vmem:[#allocation126_spill] sm:$0xff] %v2928_v46  ;;  %v4335_v46 = vld [vmem:[#allocation24_spill] sm:$0xff] }
 0x146   : > { %763 = vrot.lane.b32.xlu2 %v4329_v22, %s2058_s5  ;;  %v4336_v22 = vld [vmem:[#allocation19_spill] sm:$0xff] }
 0x147   : > { %761 = vrot.lane.b32.xlu1 %v4330_v35, %s2058_s5  ;;  %759 = vrot.lane.b32.xlu0 %v4331_v29, %s2058_s5 }
 0x148   : > { %v2936_v31 = vpop.permute.xlu2 %659 }
 0x149   : > { %v2938_v21 = vpop.permute.xlu1 %639  ;;  %v2940_v13 = vpop.permute.xlu0 %637 }
 0x14a   : > { %4332 = vst [vmem:[#allocation127_spill] sm:$0xff] %v2938_v21  ;;  %v4340_v21 = vld [vmem:[#allocation27_spill] sm:$0xff] }
 0x14b   : > { %4333 = vst [vmem:[#allocation128_spill] sm:$0xff] %v2940_v13  ;;  %v4341_v13 = vld [vmem:[#allocation28_spill] sm:$0xff] }
 0x14e   : > { %769 = vrot.lane.b32.xlu2 %v4334_v36, %s2058_s5  ;;  %v4342_v36 = vld [vmem:[#allocation22_spill] sm:$0xff] }
 0x14f   : > { %767 = vrot.lane.b32.xlu1 %v4335_v46, %s2058_s5  ;;  %765 = vrot.lane.b32.xlu0 %v4336_v22, %s2058_s5 }
 0x150   : > { %v2948_v35 = vpop.permute.xlu2 %665 }
 0x151   : > { %4337 = vst [vmem:[#allocation129_spill] sm:$0xff] %v2948_v35  ;;  %v2950_v16 = vpop.permute.xlu1 %645  ;;  %v2952_v29 = vpop.permute.xlu0 %643  ;;  %v4346_v35 = vld [vmem:[#allocation30_spill] sm:$0xff] }
 0x152   : > { %4338 = vst [vmem:[#allocation130_spill] sm:$0xff] %v2950_v16  ;;  %v2979_v16 = vld [vmem:[%s2136_s28 + $0x190] sm:$0x3] }
 0x153   : > { %4339 = vst [vmem:[#allocation131_spill] sm:$0xff] %v2952_v29 }
 0x156   : > { %775 = vrot.lane.b32.xlu2 %v4340_v21, %s2058_s5  ;;  %v4347_v21 = vld [vmem:[#allocation26_spill] sm:$0xff] }
 0x157   : > { %773 = vrot.lane.b32.xlu1 %v4341_v13, %s2058_s5  ;;  %771 = vrot.lane.b32.xlu0 %v4342_v36, %s2058_s5 }
 0x158   : > { %v2960_v46 = vpop.permute.xlu2 %671 }
 0x159   : > { %4343 = vst [vmem:[#allocation132_spill] sm:$0xff] %v2960_v46  ;;  %v2962_v43 = vpop.permute.xlu1 %651  ;;  %v2964_v22 = vpop.permute.xlu0 %649 }
 0x15a   : > { %4344 = vst [vmem:[#allocation133_spill] sm:$0xff] %v2962_v43  ;;  %v4351_v43 = vld [vmem:[#allocation29_spill] sm:$0xff] }
 0x15b   : > { %4345 = vst [vmem:[#allocation134_spill] sm:$0xff] %v2964_v22  ;;  %v4350_v22 = vld [vmem:[#allocation35_spill] sm:$0xff] }
 0x15e   : > { %781 = vrot.lane.b32.xlu2 %v4346_v35, %s2058_s5  ;;  %v727_v35 = vrot.slane %v2979_v16, 1 }
 0x15f   : > { %779 = vrot.lane.b32.xlu1 %v2454_v58, %s2058_s5  ;;  %777 = vrot.lane.b32.xlu0 %v4347_v21, %s2058_s5  ;;  %v725_v21 = vrot.slane %v2853_v3, 1 }
 0x160   : > { %v2972_v29 = vpop.permute.xlu2 %677 }
 0x161   : > { %4348 = vst [vmem:[#allocation135_spill] sm:$0xff] %v2972_v29  ;;  %v2974_v13 = vpop.permute.xlu1 %657  ;;  %v2976_v36 = vpop.permute.xlu0 %655  ;;  %v724_v29 = vrot.slane %v2856_v62, 1 }
 0x162   : > { %4349 = vst [vmem:[#allocation136_spill] sm:$0xff] %v2976_v36 }
 0x166   : > { %787 = vrot.lane.b32.xlu2 %v2478_v60, %s2058_s5  ;;  %v2997_v60 = vsel %vm271_vm0, %v725_v21, %v727_v35 }
 0x167   : > { %785 = vrot.lane.b32.xlu1 %v4350_v22, %s2058_s5  ;;  %783 = vrot.lane.b32.xlu0 %v4351_v43, %s2058_s5  ;;  %4353 = vst [vmem:[#allocation138_spill] sm:$0xff] %v2997_v60  ;;  %v3000_v22 = vsel %vm271_vm0, %v724_v29, %v725_v21  ;;  %v4356_v21 = vld [vmem:[#allocation36_spill] sm:$0xff] }
 0x168   : > { %v2987_v58 = vpop.permute.xlu2 %683  ;;  %4354 = vst [vmem:[#allocation139_spill] sm:$0xff] %v3000_v22 }
 0x169   : > { %4352 = vst [vmem:[#allocation137_spill] sm:$0xff] %v2987_v58  ;;  %v2992_v36 = vpop.permute.xlu1 %663  ;;  %v2994_v46 = vpop.permute.xlu0 %661 }
 0x16e   : > { %830 = vrot.lane.b32.xlu2 %v2496_v10, %s2059_s6 }
 0x16f   : > { %791 = vrot.lane.b32.xlu1 %v2997_v60, %s2058_s5  ;;  %789 = vrot.lane.b32.xlu0 %v3000_v22, %s2058_s5  ;;  %v4359_v60 = vld [vmem:[#allocation44_spill] sm:$0xff]  ;;  %v4360_v22 = vld [vmem:[#allocation38_spill] sm:$0xff]  ;;  %s1860_s5 = sshll.u32 %s161_s4, 4 }
 0x170   : > { %v3008_v43 = vpop.permute.xlu2 %689  ;;  %s163_s10 = scalar_lea.vmem [#allocation2], %s1860_s5 }
 0x171   : > { %4355 = vst [vmem:[#allocation140_spill] sm:$0xff] %v3008_v43  ;;  %v3010_v58 = vpop.permute.xlu1 %669  ;;  %v3012_v33 = vpop.permute.xlu0 %667  ;;  %s1794_s11 = sshll.u32 %s163_s10, 4  ;;  %s1795_s11 = int_to_ptr.vmem [resolvable:$true] %s1794_s11 }
 0x176   : > { %836 = vrot.lane.b32.xlu2 %v2515_v9, %s2059_s6 }
 0x177   : > { %834 = vrot.lane.b32.xlu1 %v2518_v47, %s2059_s6  ;;  %832 = vrot.lane.b32.xlu0 %v4356_v21, %s2059_s6  ;;  %v4363_v47 = vld [vmem:[#allocation48_spill] sm:$0xff] }
 0x178   : > { %v3020_v35 = vpop.permute.xlu2 %733 }
 0x179   : > { %4357 = vst [vmem:[#allocation36_spill] sm:$0xff] %v3020_v35  ;;  %v3022_v10 = vpop.permute.xlu1 %675  ;;  %v3024_v29 = vpop.permute.xlu0 %673  ;;  %v4362_v35 = vld [vmem:[#allocation47_spill] sm:$0xff] }
 0x17a   : > { %4358 = vst [vmem:[#allocation141_spill] sm:$0xff] %v3024_v29 }
 0x17e   : > { %842 = vrot.lane.b32.xlu2 %v2536_v44, %s2059_s6  ;;  %v4364_v44 = vld [vmem:[#allocation42_spill] sm:$0xff] }
 0x17f   : > { %840 = vrot.lane.b32.xlu1 %v4359_v60, %s2059_s6  ;;  %838 = vrot.lane.b32.xlu0 %v4360_v22, %s2059_s6 }
 0x180   : > { %v3032_v9 = vpop.permute.xlu2 %739 }
 0x181   : > { %4361 = vst [vmem:[#allocation142_spill] sm:$0xff] %v3032_v9  ;;  %v3034_v43 = vpop.permute.xlu1 %681  ;;  %v3036_v21 = vpop.permute.xlu0 %679 }
 0x186   : > { %848 = vrot.lane.b32.xlu2 %v4362_v35, %s2059_s6  ;;  %v4367_v35 = vld [vmem:[#allocation46_spill] sm:$0xff] }
 0x187   : > { %846 = vrot.lane.b32.xlu1 %v4363_v47, %s2059_s6  ;;  %844 = vrot.lane.b32.xlu0 %v4364_v44, %s2059_s6 }
 0x188   : > { %v3044_v29 = vpop.permute.xlu2 %745 }
 0x189   : > { %4365 = vst [vmem:[#allocation143_spill] sm:$0xff] %v3044_v29  ;;  %v3046_v60 = vpop.permute.xlu1 %687  ;;  %v3048_v22 = vpop.permute.xlu0 %685  ;;  %v4370_v29 = vld [vmem:[#allocation60_spill] sm:$0xff] }
 0x18a   : > { %4366 = vst [vmem:[#allocation144_spill] sm:$0xff] %v3048_v22 }
 0x18e   : > { %854 = vrot.lane.b32.xlu2 %v2583_v59, %s2059_s6  ;;  %v4371_v59 = vld [vmem:[#allocation52_spill] sm:$0xff] }
 0x18f   : > { %852 = vrot.lane.b32.xlu1 %v2586_v4, %s2059_s6  ;;  %850 = vrot.lane.b32.xlu0 %v4367_v35, %s2059_s6 }
 0x190   : > { %v3056_v9 = vpop.permute.xlu2 %751 }
 0x191   : > { %4368 = vst [vmem:[#allocation145_spill] sm:$0xff] %v3056_v9  ;;  %v3058_v47 = vpop.permute.xlu1 %731  ;;  %v3060_v44 = vpop.permute.xlu0 %729 }
 0x192   : > { %4369 = vst [vmem:[#allocation146_spill] sm:$0xff] %v3060_v44 }
 0x196   : > { %860 = vrot.lane.b32.xlu2 %v2609_v32, %s2059_s6  ;;  %v4374_v32 = vld [vmem:[#allocation58_spill] sm:$0xff] }
 0x197   : > { %858 = vrot.lane.b32.xlu1 %v4370_v29, %s2059_s6  ;;  %856 = vrot.lane.b32.xlu0 %v4371_v59, %s2059_s6 }
 0x198   : > { %v3068_v22 = vpop.permute.xlu2 %757 }
 0x199   : > { %4372 = vst [vmem:[#allocation147_spill] sm:$0xff] %v3068_v22  ;;  %v3070_v4 = vpop.permute.xlu1 %737  ;;  %v3072_v35 = vpop.permute.xlu0 %735  ;;  %v4377_v22 = vld [vmem:[#allocation72_spill] sm:$0xff] }
 0x19a   : > { %4373 = vst [vmem:[#allocation148_spill] sm:$0xff] %v3072_v35  ;;  %v4378_v35 = vld [vmem:[#allocation64_spill] sm:$0xff] }
 0x19e   : > { %866 = vrot.lane.b32.xlu2 %v2634_v7, %s2059_s6  ;;  %v826_v7 = vrot.slane %v2853_v3, 2 }
 0x19f   : > { %864 = vrot.lane.b32.xlu1 %v2637_v8, %s2059_s6  ;;  %862 = vrot.lane.b32.xlu0 %v4374_v32, %s2059_s6 }
 0x1a0   : > { %v3080_v9 = vpop.permute.xlu2 %763 }
 0x1a1   : > { %v3082_v29 = vpop.permute.xlu1 %743  ;;  %v3084_v59 = vpop.permute.xlu0 %741 }
 0x1a2   : > { %4375 = vst [vmem:[#allocation149_spill] sm:$0xff] %v3082_v29 }
 0x1a3   : > { %4376 = vst [vmem:[#allocation150_spill] sm:$0xff] %v3084_v59 }
 0x1a6   : > { %872 = vrot.lane.b32.xlu2 %v2660_v27, %s2059_s6  ;;  %v4381_v27 = vld [vmem:[#allocation70_spill] sm:$0xff] }
 0x1a7   : > { %870 = vrot.lane.b32.xlu1 %v4377_v22, %s2059_s6  ;;  %868 = vrot.lane.b32.xlu0 %v4378_v35, %s2059_s6 }
 0x1a8   : > { %v3092_v44 = vpop.permute.xlu2 %769 }
 0x1a9   : > { %v3094_v8 = vpop.permute.xlu1 %749  ;;  %v3096_v32 = vpop.permute.xlu0 %747 }
 0x1aa   : > { %4379 = vst [vmem:[#allocation151_spill] sm:$0xff] %v3094_v8 }
 0x1ab   : > { %4380 = vst [vmem:[#allocation152_spill] sm:$0xff] %v3096_v32  ;;  %v825_v32 = vrot.slane %v2856_v62, 2 }
 0x1ae   : > { %878 = vrot.lane.b32.xlu2 %v2685_v15, %s2059_s6  ;;  %v4384_v15 = vld [vmem:[#allocation76_spill] sm:$0xff] }
 0x1af   : > { %876 = vrot.lane.b32.xlu1 %v2688_v14, %s2059_s6  ;;  %874 = vrot.lane.b32.xlu0 %v4381_v27, %s2059_s6 }
 0x1b0   : > { %v3104_v59 = vpop.permute.xlu2 %775 }
 0x1b1   : > { %v3106_v22 = vpop.permute.xlu1 %755  ;;  %v3108_v35 = vpop.permute.xlu0 %753 }
 0x1b2   : > { %4382 = vst [vmem:[#allocation153_spill] sm:$0xff] %v3106_v22 }
 0x1b3   : > { %4383 = vst [vmem:[#allocation154_spill] sm:$0xff] %v3108_v35  ;;  %v3123_v35 = vsel %vm448_vm1, %v825_v32, %v826_v7 }
 0x1b4   : > { %4385 = vst [vmem:[#allocation155_spill] sm:$0xff] %v3123_v35 }
 0x1b6   : > { %884 = vrot.lane.b32.xlu2 %v2711_v12, %s2059_s6 }
 0x1b7   : > { %882 = vrot.lane.b32.xlu1 %v2714_v51, %s2059_s6  ;;  %880 = vrot.lane.b32.xlu0 %v4384_v15, %s2059_s6  ;;  %v828_v15 = vrot.slane %v2979_v16, 2 }
 0x1b8   : > { %v3118_v14 = vpop.permute.xlu2 %781 }
 0x1b9   : > { %v3120_v27 = vpop.permute.xlu1 %761  ;;  %v760_v22 = vpop.permute.xlu0 %759  ;;  %v3137_v29 = vsel %vm448_vm1, %v826_v7, %v828_v15  ;;  %v1243_v15 = vsel %vm1227_vm2, %v2262_v49, %v2705_v38 }
 0x1ba   : > { %4386 = vst [vmem:[#allocation156_spill] sm:$0xff] %v3137_v29 }
 0x1be   : > { %890 = vrot.lane.b32.xlu2 %v3123_v35, %s2059_s6 }
 0x1bf   : > { %888 = vrot.lane.b32.xlu1 %v2730_v55, %s2059_s6  ;;  %886 = vrot.lane.b32.xlu0 %v2708_v40, %s2059_s6 }
 0x1c0   : > { %v3131_v12 = vpop.permute.xlu2 %787 }
 0x1c1   : > { %v3134_v51 = vpop.permute.xlu1 %767  ;;  %v766_v8 = vpop.permute.xlu0 %765 }
 0x1c6   : > { %930 = vrot.lane.b32.xlu2 %v2142_v1, %s2060_s7 }
 0x1c7   : > { %928 = vrot.lane.b32.xlu1 %v2139_v0, %s2060_s7  ;;  %892 = vrot.lane.b32.xlu0 %v3137_v29, %s2059_s6  ;;  %s1900_s6 = sshll.u32 %s2104_s16, 4 }
 0x1c8   : > { %v3145_v32 = vpop.permute.xlu2 %830 }
 0x1c9   : > { %v3147_v35 = vpop.permute.xlu1 %773  ;;  %v772_v16 = vpop.permute.xlu0 %771 }
 0x1ce   : > { %936 = vrot.lane.b32.xlu2 %v2194_v24, %s2060_s7 }
 0x1cf   : > { %934 = vrot.lane.b32.xlu1 %v2200_v26, %s2060_s7  ;;  %932 = vrot.lane.b32.xlu0 %v2206_v28, %s2060_s7 }
 0x1d0   : > { %v3155_v1 = vpop.permute.xlu2 %836 }
 0x1d1   : > { %v3157_v0 = vpop.permute.xlu1 %779  ;;  %v3159_v7 = vpop.permute.xlu0 %777 }
 0x1d6   : > { %942 = vrot.lane.b32.xlu2 %v2228_v37, %s2060_s7 }
 0x1d7   : > { %940 = vrot.lane.b32.xlu1 %v2234_v39, %s2060_s7  ;;  %938 = vrot.lane.b32.xlu0 %v2197_v25, %s2060_s7 }
 0x1d8   : > { %v3167_v24 = vpop.permute.xlu2 %842 }
 0x1d9   : > { %v3169_v26 = vpop.permute.xlu1 %785  ;;  %v3171_v28 = vpop.permute.xlu0 %783 }
 0x1de   : > { %948 = vrot.lane.b32.xlu2 %v2259_v48, %s2060_s7 }
 0x1df   : > { %946 = vrot.lane.b32.xlu1 %v2265_v50, %s2060_s7  ;;  %944 = vrot.lane.b32.xlu0 %v2271_v52, %s2060_s7 }
 0x1e0   : > { %v3179_v37 = vpop.permute.xlu2 %848 }
 0x1e1   : > { %v3181_v39 = vpop.permute.xlu1 %791  ;;  %v3183_v25 = vpop.permute.xlu0 %789 }
 0x1e6   : > { %954 = vrot.lane.b32.xlu2 %v2294_v61, %s2060_s7  ;;  %v1276_v61 = vsel %vm1260_vm3, %v1243_v15, %v2798_v5 }
 0x1e7   : > { %952 = vrot.lane.b32.xlu1 %v2300_v63, %s2060_s7  ;;  %950 = vrot.lane.b32.xlu0 %v2262_v49, %s2060_s7  ;;  %v1309_v63 = vsel %vm1293_vm4, %v1276_v61, %v2974_v13  ;;  %v1246_v13 = vsel %vm1227_vm2, %v2337_v30, %v2727_v57 }
 0x1e8   : > { %v3191_v48 = vpop.permute.xlu2 %854  ;;  %v1342_v49 = vsel %vm1326_vm5, %v1309_v63, %v760_v22 }
 0x1e9   : > { %v3193_v50 = vpop.permute.xlu1 %834  ;;  %v3195_v52 = vpop.permute.xlu0 %832 }
 0x1ee   : > { %960 = vrot.lane.b32.xlu2 %v2325_v19, %s2060_s7 }
 0x1ef   : > { %958 = vrot.lane.b32.xlu1 %v2331_v23, %s2060_s7  ;;  %956 = vrot.lane.b32.xlu0 %v2337_v30, %s2060_s7  ;;  %v1279_v23 = vsel %vm1260_vm3, %v1246_v13, %v2810_v45 }
 0x1f0   : > { %v861_v38 = vpop.permute.xlu2 %860  ;;  %v1312_v22 = vsel %vm1293_vm4, %v1279_v23, %v2992_v36  ;;  %v1249_v36 = vsel %vm1227_vm2, %v2328_v20, %v2742_v18 }
 0x1f1   : > { %v3211_v29 = vpop.permute.xlu1 %840  ;;  %v3214_v5 = vsel %vm1359_vm6, %v1342_v49, %v861_v38  ;;  %v3216_v19 = vpop.permute.xlu0 %838  ;;  %v1345_v15 = vsel %vm1326_vm5, %v1312_v22, %v766_v8  ;;  %v4389_v38 = vld [vmem:[#allocation25_spill] sm:$0xff] }
 0x1f6   : > { %966 = vrot.lane.b32.xlu2 %v2360_v54, %s2060_s7  ;;  %v1282_v54 = vsel %vm1260_vm3, %v1249_v36, %v2822_v2  ;;  %v4387_v2 = vld [vmem:[#allocation89_spill] sm:$0xff] }
 0x1f7   : > { %964 = vrot.lane.b32.xlu1 %v2366_v56, %s2060_s7  ;;  %962 = vrot.lane.b32.xlu0 %v2328_v20, %s2060_s7  ;;  %v1315_v56 = vsel %vm1293_vm4, %v1282_v54, %v3010_v58  ;;  %v1252_v58 = vsel %vm1227_vm2, %v2403_v6, %v4387_v2  ;;  %v1966_v54 = vld [vmem:[%s2136_s28 + $0xc0] sm:$0xff] }
 0x1f8   : > { %v867_v61 = vpop.permute.xlu2 %866  ;;  %v1348_v8 = vsel %vm1326_vm5, %v1315_v56, %v772_v16  ;;  %v4392_v56 = vld [vmem:[#allocation80_spill] sm:$0xff]  ;;  %v4394_v2 = vld [vmem:[#allocation109_spill] sm:$0xff] }
 0x1f9   : > { %v3232_v63 = vpop.permute.xlu1 %846  ;;  %v3235_v30 = vsel %vm1359_vm6, %v1345_v15, %v867_v61  ;;  %v3237_v57 = vpop.permute.xlu0 %844  ;;  %v1965_v61 = vld [vmem:[%s2136_s28 + $0xc8] sm:$0xff] }
 0x1fe   : > { %972 = vrot.lane.b32.xlu2 %v2391_v42, %s2060_s7 }
 0x1ff   : > { %970 = vrot.lane.b32.xlu1 %v2397_v11, %s2060_s7  ;;  %968 = vrot.lane.b32.xlu0 %v2403_v6, %s2060_s7  ;;  %v4388_v11 = vld [vmem:[#allocation105_spill] sm:$0xff] }
 0x200   : > { %v873_v45 = vpop.permute.xlu2 %872  ;;  %v1285_v49 = vsel %vm1260_vm3, %v1252_v58, %v4388_v11  ;;  %v4395_v11 = vld [vmem:[#allocation110_spill] sm:$0xff] }
 0x201   : > { %v3253_v20 = vpop.permute.xlu1 %852  ;;  %v3256_v18 = vsel %vm1359_vm6, %v1348_v8, %v873_v45  ;;  %v3258_v42 = vpop.permute.xlu0 %850  ;;  %v1318_v16 = vsel %vm1293_vm4, %v1285_v49, %v3022_v10  ;;  %v4393_v8 = vld [vmem:[#allocation108_spill] sm:$0xff] }
 0x202   : > { %v1351_v13 = vsel %vm1326_vm5, %v1318_v16, %v3159_v7  ;;  %v1244_v7 = vsel %vm1227_vm2, %v1966_v54, %v4392_v56  ;;  %v3325_v56 = vld [vmem:[%s2136_s28 + $0x1a0] sm:$0xff] }
 0x203   : > { %v1277_v49 = vsel %vm1260_vm3, %v1244_v7, %v4395_v11  ;;  %v4398_v7 = vld [vmem:[#allocation95_spill] sm:$0xff] }
 0x206   : > { %978 = vrot.lane.b32.xlu2 %v2426_v41, %s2060_s7  ;;  %v4390_v41 = vld [vmem:[#allocation92_spill] sm:$0xff] }
 0x207   : > { %976 = vrot.lane.b32.xlu1 %v2432_v17, %s2060_s7  ;;  %974 = vrot.lane.b32.xlu0 %v4389_v38, %s2060_s7  ;;  %v1255_v10 = vsel %vm1227_vm2, %v4389_v38, %v4390_v41  ;;  %v4391_v17 = vld [vmem:[#allocation61_spill] sm:$0xff]  ;;  %v4396_v38 = vld [vmem:[#allocation32_spill] sm:$0xff] }
 0x208   : > { %v879_v23 = vpop.permute.xlu2 %878  ;;  %v1245_v36 = vsel %vm1227_vm2, %v1965_v61, %v4391_v17  ;;  %v1288_v45 = vsel %vm1260_vm3, %v1255_v10, %v4393_v8  ;;  %v4399_v8 = vld [vmem:[#allocation67_spill] sm:$0xff] }
 0x209   : > { %v3275_v6 = vpop.permute.xlu1 %858  ;;  %v3278_v22 = vsel %vm1359_vm6, %v1351_v13, %v879_v23  ;;  %v3280_v15 = vpop.permute.xlu0 %856  ;;  %v1278_v58 = vsel %vm1260_vm3, %v1245_v36, %v4394_v2  ;;  %v1321_v16 = vsel %vm1293_vm4, %v1288_v45, %v3034_v43  ;;  %v4397_v13 = vld [vmem:[#allocation33_spill] sm:$0xff] }
 0x20a   : > { %v1311_v23 = vsel %vm1293_vm4, %v1278_v58, %v2994_v46  ;;  %v1354_v41 = vsel %vm1326_vm5, %v1321_v16, %v3171_v28  ;;  %v3328_v28 = vld [vmem:[%s2136_s28 + $0x198] sm:$0xff]  ;;  %v1968_v2 = vld [vmem:[%s2136_s28 + $0xe0] sm:$0xff] }
 0x20b   : > { %v1344_v43 = vsel %vm1326_vm5, %v1311_v23, %v3080_v9  ;;  %v1258_v9 = vsel %vm1227_vm2, %v4397_v13, %v4398_v7  ;;  %v4400_v58 = vld [vmem:[#allocation84_spill] sm:$0xff]  ;;  %v1969_v7 = vld [vmem:[%s2136_s28 + $0x8] sm:$0xff] }
 0x20c   : > { %v1247_v11 = vsel %vm1227_vm2, %v1968_v2, %v4400_v58  ;;  %v1971_v2 = vld [vmem:[%s2136_s28 + $0x108] sm:$0xff] }
 0x20d   : > { %v4406_v58 = vld [vmem:[#allocation86_spill] sm:$0xff] }
 0x20e   : > { %984 = vrot.lane.b32.xlu2 %v2856_v62, %s2060_s7  ;;  %v1310_v62 = vsel %vm1293_vm4, %v1277_v49, %v2936_v31  ;;  %v1291_v49 = vsel %vm1260_vm3, %v1258_v9, %v2864_v53  ;;  %v4402_v53 = vld [vmem:[#allocation129_spill] sm:$0xff] }
 0x20f   : > { %982 = vrot.lane.b32.xlu1 %v4396_v38, %s2060_s7  ;;  %980 = vrot.lane.b32.xlu0 %v4397_v13, %s2060_s7  ;;  %v1343_v61 = vsel %vm1326_vm5, %v1310_v62, %v3120_v27  ;;  %v1967_v27 = vld [vmem:[%s2136_s28 + $0xf0] sm:$0xff]  ;;  %v1324_v62 = vsel %vm1293_vm4, %v1291_v49, %v3046_v60  ;;  %v4407_v49 = vld [vmem:[#allocation112_spill] sm:$0xff] }
 0x210   : > { %v885_v10 = vpop.permute.xlu2 %884  ;;  %v1248_v45 = vsel %vm1227_vm2, %v1967_v27, %v4399_v8  ;;  %v4401_v38 = vld [vmem:[#allocation111_spill] sm:$0xff]  ;;  %v4404_v27 = vld [vmem:[#allocation98_spill] sm:$0xff] }
 0x211   : > { %v865_v17 = vpop.permute.xlu1 %864  ;;  %v3316_v36 = vsel %vm1359_vm6, %v1354_v41, %v885_v10  ;;  %v863_v54 = vpop.permute.xlu0 %862  ;;  %v1281_v16 = vsel %vm1260_vm3, %v1248_v45, %v2866_v34  ;;  %v1280_v13 = vsel %vm1260_vm3, %v1247_v11, %v4401_v38  ;;  %v1357_v41 = vsel %vm1326_vm5, %v1324_v62, %v3183_v25  ;;  %v4403_v25 = vld [vmem:[#allocation57_spill] sm:$0xff]  ;;  %v1970_v8 = vld [vmem:[%s2136_s28 + $0x110] sm:$0xff] }
 0x212   : > { %v3319_v31 = vsel %vm1359_vm6, %v1344_v43, %v865_v17  ;;  %v3322_v46 = vsel %vm1359_vm6, %v1343_v61, %v863_v54  ;;  %v1313_v23 = vsel %vm1293_vm4, %v1280_v13, %v4402_v53  ;;  %v1314_v34 = vsel %vm1293_vm4, %v1281_v16, %v3012_v33  ;;  %v4408_v38 = vld [vmem:[#allocation9_spill] sm:$0xff]  ;;  %v4410_v53 = vld [vmem:[#allocation114_spill] sm:$0xff] }
 0x213   : > { %v1347_v60 = vsel %vm1326_vm5, %v1314_v34, %v3092_v44  ;;  %v1346_v43 = vsel %vm1326_vm5, %v1313_v23, %v3134_v51  ;;  %v1229_v9 = vsel %vm1227_vm2, %v1969_v7, %v4403_v25  ;;  %v4405_v51 = vld [vmem:[#allocation73_spill] sm:$0xff]  ;;  %v1250_v11 = vsel %vm1227_vm2, %v1971_v2, %v4406_v58  ;;  %v1972_v2 = vld [vmem:[%s2136_s28 + $0x30] sm:$0xff] }
 0x214   : > { %v1262_v44 = vsel %vm1260_vm3, %v1229_v9, %v4404_v27  ;;  %v1251_v45 = vsel %vm1227_vm2, %v1970_v8, %v4405_v51  ;;  %v4409_v13 = vld [vmem:[#allocation113_spill] sm:$0xff]  ;;  %v1283_v23 = vsel %vm1260_vm3, %v1250_v11, %v4410_v53  ;;  %v4416_v11 = vld [vmem:[#allocation100_spill] sm:$0xff]  ;;  %v4419_v53 = vld [vmem:[#allocation115_spill] sm:$0xff] }
 0x215   : > { %v1295_v16 = vsel %vm1293_vm4, %v1262_v44, %v4407_v49  ;;  %v1284_v62 = vsel %vm1260_vm3, %v1251_v45, %v4409_v13  ;;  %v1973_v49 = vld [vmem:[%s2136_s28 + $0x138] sm:$0xff] }
 0x216   : > { %990 = vrot.lane.b32.xlu2 %v3325_v56, %s2060_s7  ;;  %v1328_v34 = vsel %vm1326_vm5, %v1295_v16, %v3058_v47  ;;  %v4418_v13 = vld [vmem:[#allocation88_spill] sm:$0xff] }
 0x217   : > { %988 = vrot.lane.b32.xlu1 %v3328_v28, %s2060_s7  ;;  %986 = vrot.lane.b32.xlu0 %v2853_v3, %s2060_s7  ;;  %v1361_v7 = vsel %vm1359_vm6, %v1328_v34, %v3195_v52  ;;  %v4415_v52 = vld [vmem:[#allocation37_spill] sm:$0xff]  ;;  %v4420_v34 = vld [vmem:[#allocation12_spill] sm:$0xff] }
 0x218   : > { %v891_v10 = vpop.permute.xlu2 %890  ;;  %v1232_v58 = vsel %vm1227_vm2, %v1972_v2, %v4415_v52 }
 0x219   : > { %v871_v61 = vpop.permute.xlu1 %870  ;;  %v3364_v3 = vsel %vm1359_vm6, %v1357_v41, %v891_v10  ;;  %v869_v17 = vpop.permute.xlu0 %868  ;;  %v4411_v41 = vld [vmem:[#allocation6_spill] sm:$0xff]  ;;  %v4412_v10 = vld [vmem:[#allocation5_spill] sm:$0xff] }
 0x21a   : > { %v3367_v54 = vsel %vm1359_vm6, %v1347_v60, %v871_v61  ;;  %v3370_v33 = vsel %vm1359_vm6, %v1346_v43, %v869_v17  ;;  %v4413_v60 = vld [vmem:[#allocation132_spill] sm:$0xff]  ;;  %v4414_v61 = vld [vmem:[#allocation141_spill] sm:$0xff] }
 0x21b   : > { %v1316_v43 = vsel %vm1293_vm4, %v1283_v23, %v4413_v60  ;;  %v1317_v17 = vsel %vm1293_vm4, %v1284_v62, %v4414_v61  ;;  %v4422_v60 = vld [vmem:[#allocation117_spill] sm:$0xff] }
 0x21c   : > { %v1350_v47 = vsel %vm1326_vm5, %v1317_v17, %v3104_v59  ;;  %v1349_v9 = vsel %vm1326_vm5, %v1316_v43, %v3147_v35  ;;  %v1265_v59 = vsel %vm1260_vm3, %v1232_v58, %v4416_v11  ;;  %v4417_v35 = vld [vmem:[#allocation79_spill] sm:$0xff] }
 0x21d   : > { %v1254_v16 = vsel %vm1227_vm2, %v1973_v49, %v4417_v35  ;;  %v1298_v23 = vsel %vm1293_vm4, %v1265_v59, %v4419_v53  ;;  %v4423_v17 = vld [vmem:[#allocation7_spill] sm:$0xff] }
 0x21e   : > { %1034 = vrot.lane.b32.xlu2 %v4408_v38, %s2061_s8  ;;  %v1974_v38 = vld [vmem:[%s2136_s28 + $0x128] sm:$0xff]  ;;  %v1331_v61 = vsel %vm1326_vm5, %v1298_v23, %v3070_v4  ;;  %v1975_v49 = vld [vmem:[%s2136_s28 + $0x50] sm:$0xff] }
 0x21f   : > { %1032 = vrot.lane.b32.xlu1 %v4411_v41, %s2061_s8  ;;  %1030 = vrot.lane.b32.xlu0 %v4412_v10, %s2061_s8  ;;  %v1253_v62 = vsel %vm1227_vm2, %v1974_v38, %v4418_v13  ;;  %v4421_v41 = vld [vmem:[#allocation116_spill] sm:$0xff]  ;;  %v4429_v53 = vld [vmem:[#allocation91_spill] sm:$0xff] }
 0x220   : > { %v931_v25 = vpop.permute.xlu2 %930  ;;  %v1287_v10 = vsel %vm1260_vm3, %v1254_v16, %v4421_v41  ;;  %v1286_v43 = vsel %vm1260_vm3, %v1253_v62, %v4422_v60  ;;  %v4427_v16 = vld [vmem:[#allocation102_spill] sm:$0xff]  ;;  %v1976_v38 = vld [vmem:[%s2136_s28 + $0x158] sm:$0xff]  ;;  %v1977_v62 = vld [vmem:[%s2136_s28 + $0x150] sm:$0xff] }
 0x221   : > { %v877_v27 = vpop.permute.xlu1 %876  ;;  %v3408_v44 = vsel %vm1392_vm7, %v1361_v7, %v931_v25  ;;  %v875_v8 = vpop.permute.xlu0 %874  ;;  %v4424_v7 = vld [vmem:[#allocation8_spill] sm:$0xff]  ;;  %v4425_v25 = vld [vmem:[#allocation135_spill] sm:$0xff]  ;;  %v1256_v23 = vsel %vm1227_vm2, %v1977_v62, %v4429_v53  ;;  %v1979_v53 = vld [vmem:[%s2136_s28] sm:$0xff] }
 0x222   : > { %v3411_v51 = vsel %vm1359_vm6, %v1350_v47, %v877_v27  ;;  %v3414_v45 = vsel %vm1359_vm6, %v1349_v9, %v875_v8  ;;  %v1319_v47 = vsel %vm1293_vm4, %v1286_v43, %v4425_v25  ;;  %v1320_v9 = vsel %vm1293_vm4, %v1287_v10, %v3036_v21  ;;  %v4431_v10 = vld [vmem:[#allocation15_spill] sm:$0xff] }
 0x223   : > { %v1364_v27 = vsel %vm1359_vm6, %v1331_v61, %v3216_v19  ;;  %v1353_v4 = vsel %vm1326_vm5, %v1320_v9, %v3118_v14  ;;  %v1352_v2 = vsel %vm1326_vm5, %v1319_v47, %v3157_v0  ;;  %v4426_v19 = vld [vmem:[#allocation62_spill] sm:$0xff]  ;;  %v4428_v0 = vld [vmem:[#allocation83_spill] sm:$0xff]  ;;  %v4433_v61 = vld [vmem:[#allocation120_spill] sm:$0xff] }
 0x224   : > { %v1235_v35 = vsel %vm1227_vm2, %v1975_v49, %v4426_v19  ;;  %v1257_v13 = vsel %vm1227_vm2, %v1976_v38, %v4428_v0  ;;  %v4432_v60 = vld [vmem:[#allocation119_spill] sm:$0xff]  ;;  %v4435_v47 = vld [vmem:[#allocation10_spill] sm:$0xff] }
 0x225   : > { %v1268_v14 = vsel %vm1260_vm3, %v1235_v35, %v4427_v16  ;;  %v1290_v43 = vsel %vm1260_vm3, %v1257_v13, %v4432_v60  ;;  %v4436_v9 = vld [vmem:[#allocation11_spill] sm:$0xff]  ;;  %v1978_v13 = vld [vmem:[%s2136_s28 + $0x78] sm:$0xff] }
 0x226   : > { %1040 = vrot.lane.b32.xlu2 %v4420_v34, %s2061_s8  ;;  %v4430_v34 = vld [vmem:[#allocation118_spill] sm:$0xff]  ;;  %v1980_v60 = vld [vmem:[%s2136_s28 + $0x170] sm:$0xff] }
 0x227   : > { %1038 = vrot.lane.b32.xlu1 %v4423_v17, %s2061_s8  ;;  %1036 = vrot.lane.b32.xlu0 %v4424_v7, %s2061_s8  ;;  %v1301_v41 = vsel %vm1293_vm4, %v1268_v14, %v4430_v34  ;;  %v1289_v17 = vsel %vm1260_vm3, %v1256_v23, %v4433_v61  ;;  %v4434_v7 = vld [vmem:[#allocation149_spill] sm:$0xff] }
 0x228   : > { %v937_v8 = vpop.permute.xlu2 %936  ;;  %v1334_v25 = vsel %vm1326_vm5, %v1301_v41, %v4434_v7  ;;  %v4442_v41 = vld [vmem:[#allocation85_spill] sm:$0xff] }
 0x229   : > { %v883_v52 = vpop.permute.xlu1 %882  ;;  %v3452_v58 = vsel %vm1392_vm7, %v1364_v27, %v937_v8  ;;  %v881_v11 = vpop.permute.xlu0 %880  ;;  %v4437_v27 = vld [vmem:[#allocation137_spill] sm:$0xff] }
 0x22a   : > { %v3455_v59 = vsel %vm1359_vm6, %v1353_v4, %v883_v52  ;;  %v3458_v21 = vsel %vm1359_vm6, %v1352_v2, %v881_v11  ;;  %v1322_v8 = vsel %vm1293_vm4, %v1289_v17, %v4437_v27  ;;  %v4438_v4 = vld [vmem:[#allocation144_spill] sm:$0xff]  ;;  %v1367_v52 = vsel %vm1359_vm6, %v1334_v25, %v3237_v57  ;;  %v4444_v17 = vld [vmem:[#allocation121_spill] sm:$0xff]  ;;  %v4447_v27 = vld [vmem:[#allocation123_spill] sm:$0xff] }
 0x22b   : > { %v1323_v2 = vsel %vm1293_vm4, %v1290_v43, %v4438_v4  ;;  %v1355_v19 = vsel %vm1326_vm5, %v1322_v8, %v3169_v26  ;;  %v4439_v57 = vld [vmem:[#allocation68_spill] sm:$0xff]  ;;  %v4443_v43 = vld [vmem:[#allocation94_spill] sm:$0xff]  ;;  %v4448_v4 = vld [vmem:[#allocation151_spill] sm:$0xff] }
 0x22c   : > { %v1356_v49 = vsel %vm1326_vm5, %v1323_v2, %v3131_v12  ;;  %v1238_v62 = vsel %vm1227_vm2, %v1978_v13, %v4439_v57  ;;  %v4440_v12 = vld [vmem:[#allocation51_spill] sm:$0xff]  ;;  %v4441_v26 = vld [vmem:[#allocation104_spill] sm:$0xff]  ;;  %v1259_v61 = vsel %vm1227_vm2, %v1980_v60, %v4443_v43 }
 0x22d   : > { %v1228_v23 = vsel %vm1227_vm2, %v1979_v53, %v4440_v12  ;;  %v1271_v34 = vsel %vm1260_vm3, %v1238_v62, %v4441_v26  ;;  %v4445_v25 = vld [vmem:[#allocation40_spill] sm:$0xff]  ;;  %v1292_v8 = vsel %vm1260_vm3, %v1259_v61, %v4447_v27 }
 0x22e   : > { %1046 = vrot.lane.b32.xlu2 %v4431_v10, %s2061_s8  ;;  %v1261_v10 = vsel %vm1260_vm3, %v1228_v23, %v4442_v41  ;;  %v1304_v7 = vsel %vm1293_vm4, %v1271_v34, %v4444_v17  ;;  %v1982_v43 = vld [vmem:[%s2136_s28 + $0x18] sm:$0xff] }
 0x22f   : > { %1044 = vrot.lane.b32.xlu1 %v4435_v47, %s2061_s8  ;;  %1042 = vrot.lane.b32.xlu0 %v4436_v9, %s2061_s8  ;;  %v4446_v47 = vld [vmem:[#allocation122_spill] sm:$0xff]  ;;  %v1337_v2 = vsel %vm1326_vm5, %v1304_v7, %v4448_v4  ;;  %v4455_v17 = vld [vmem:[#allocation56_spill] sm:$0xff] }
 0x230   : > { %v943_v11 = vpop.permute.xlu2 %942  ;;  %v1294_v9 = vsel %vm1293_vm4, %v1261_v10, %v4446_v47  ;;  %v1370_v13 = vsel %vm1359_vm6, %v1337_v2, %v3258_v42  ;;  %v1981_v10 = vld [vmem:[%s2136_s28 + $0x98] sm:$0xff]  ;;  %v4453_v42 = vld [vmem:[#allocation74_spill] sm:$0xff] }
 0x231   : > { %v889_v35 = vpop.permute.xlu1 %888  ;;  %v3496_v16 = vsel %vm1392_vm7, %v1367_v52, %v943_v11  ;;  %v887_v14 = vpop.permute.xlu0 %886  ;;  %v4449_v52 = vld [vmem:[#allocation65_spill] sm:$0xff]  ;;  %v4450_v11 = vld [vmem:[#allocation19_spill] sm:$0xff]  ;;  %v1241_v60 = vsel %vm1227_vm2, %v1981_v10, %v4453_v42  ;;  %v4459_v2 = vld [vmem:[#allocation124_spill] sm:$0xff] }
 0x232   : > { %v3499_v38 = vsel %vm1359_vm6, %v1356_v49, %v889_v35  ;;  %v3502_v0 = vsel %vm1359_vm6, %v1355_v19, %v887_v14  ;;  %v4451_v49 = vld [vmem:[#allocation140_spill] sm:$0xff]  ;;  %v4452_v35 = vld [vmem:[#allocation146_spill] sm:$0xff] }
 0x233   : > { %v1325_v19 = vsel %vm1293_vm4, %v1292_v8, %v4451_v49  ;;  %v1327_v14 = vsel %vm1326_vm5, %v1294_v9, %v4452_v35  ;;  %v4457_v9 = vld [vmem:[#allocation87_spill] sm:$0xff]  ;;  %v4458_v8 = vld [vmem:[#allocation97_spill] sm:$0xff]  ;;  %v4462_v35 = vld [vmem:[#allocation126_spill] sm:$0xff] }
 0x234   : > { %v1360_v62 = vsel %vm1359_vm6, %v1327_v14, %v3145_v32  ;;  %v1358_v53 = vsel %vm1326_vm5, %v1325_v19, %v3181_v39  ;;  %v4454_v32 = vld [vmem:[#allocation50_spill] sm:$0xff]  ;;  %v1983_v39 = vld [vmem:[%s2136_s28 + $0x20] sm:$0xff]  ;;  %v4467_v10 = vld [vmem:[#allocation148_spill] sm:$0xff] }
 0x235   : > { %v1230_v61 = vsel %vm1227_vm2, %v1982_v43, %v4454_v32  ;;  %v1231_v7 = vsel %vm1227_vm2, %v1983_v39, %v4455_v17  ;;  %v4461_v49 = vld [vmem:[#allocation125_spill] sm:$0xff] }
 0x236   : > { %1131 = vrot.lane.b32.xlu2 %v4445_v25, %s2062_s9  ;;  %v4456_v25 = vld [vmem:[#allocation107_spill] sm:$0xff]  ;;  %v1264_v27 = vsel %vm1260_vm3, %v1231_v7, %v4457_v9  ;;  %v1263_v4 = vsel %vm1260_vm3, %v1230_v61, %v4458_v8  ;;  %v1984_v9 = vld [vmem:[%s2136_s28 + $0x38] sm:$0xff]  ;;  %v1985_v8 = vld [vmem:[%s2136_s28 + $0x48] sm:$0xff] }
 0x237   : > { %1163 = vrot.lane.b32.xlu1 %v4449_v52, %s2062_s9  ;;  %1062 = vrot.lane.b32.xlu0 %v4450_v11, %s2061_s8  ;;  %v1274_v47 = vsel %vm1260_vm3, %v1241_v60, %v4456_v25  ;;  %v4460_v11 = vld [vmem:[#allocation39_spill] sm:$0xff]  ;;  %v1297_v19 = vsel %vm1293_vm4, %v1264_v27, %v4461_v49  ;;  %v1296_v14 = vsel %vm1293_vm4, %v1263_v4, %v4462_v35  ;;  %v4472_v49 = vld [vmem:[#allocation38_spill] sm:$0xff] }
 0x238   : > { %v949_v57 = vpop.permute.xlu2 %948  ;;  %v1307_v52 = vsel %vm1293_vm4, %v1274_v47, %v4459_v2  ;;  %v1330_v42 = vsel %vm1326_vm5, %v1297_v19, %v4467_v10  ;;  %v4473_v19 = vld [vmem:[#allocation127_spill] sm:$0xff] }
 0x239   : > { %v929_v12 = vpop.permute.xlu1 %928  ;;  %v3542_v23 = vsel %vm1392_vm7, %v1370_v13, %v949_v57  ;;  %v893_v26 = vpop.permute.xlu0 %892  ;;  %v4463_v13 = vld [vmem:[#allocation153_spill] sm:$0xff]  ;;  %v1363_v32 = vsel %vm1359_vm6, %v1330_v42, %v3155_v1  ;;  %v4469_v1 = vld [vmem:[#allocation63_spill] sm:$0xff] }
 0x23a   : > { %v3545_v34 = vsel %vm1392_vm7, %v1360_v62, %v929_v12  ;;  %v3548_v41 = vsel %vm1359_vm6, %v1358_v53, %v893_v26  ;;  %v1340_v57 = vsel %vm1326_vm5, %v1307_v52, %v4463_v13  ;;  %v4464_v62 = vld [vmem:[#allocation64_spill] sm:$0xff]  ;;  %v1234_v4 = vsel %vm1227_vm2, %v1985_v8, %v4469_v1  ;;  %v4471_v52 = vld [vmem:[#allocation99_spill] sm:$0xff]  ;;  %v4480_v1 = vld [vmem:[#allocation69_spill] sm:$0xff] }
 0x23b   : > { %v4465_v53 = vld [vmem:[#allocation24_spill] sm:$0xff]  ;;  %v1373_v60 = vsel %vm1359_vm6, %v1340_v57, %v3280_v15  ;;  %v4468_v15 = vld [vmem:[#allocation41_spill] sm:$0xff] }
 0x23c   : > { %v4466_v12 = vld [vmem:[#allocation36_spill] sm:$0xff]  ;;  %v1233_v27 = vsel %vm1227_vm2, %v1984_v9, %v4468_v15  ;;  %v1986_v15 = vld [vmem:[%s2136_s28 + $0x60] sm:$0xff] }
 0x23d   : > { %v1329_v26 = vsel %vm1326_vm5, %v1296_v14, %v4466_v12  ;;  %v4474_v14 = vld [vmem:[#allocation128_spill] sm:$0xff] }
 0x23e   : > { %1133 = vrot.lane.b32.xlu2 %v4460_v11, %s2062_s9  ;;  %v1362_v61 = vsel %vm1359_vm6, %v1329_v26, %v3193_v50  ;;  %v4470_v50 = vld [vmem:[#allocation90_spill] sm:$0xff]  ;;  %v1266_v11 = vsel %vm1260_vm3, %v1233_v27, %v4471_v52  ;;  %v4475_v57 = vld [vmem:[#allocation72_spill] sm:$0xff]  ;;  %v4479_v27 = vld [vmem:[#allocation45_spill] sm:$0xff] }
 0x23f   : > { %1165 = vrot.lane.b32.xlu1 %v4464_v62, %s2062_s9  ;;  %1064 = vrot.lane.b32.xlu0 %v4465_v53, %s2061_s8  ;;  %v1267_v2 = vsel %vm1260_vm3, %v1234_v4, %v4470_v50  ;;  %v1299_v13 = vsel %vm1293_vm4, %v1266_v11, %v4474_v14  ;;  %v4476_v62 = vld [vmem:[#allocation23_spill] sm:$0xff]  ;;  %v4477_v53 = vld [vmem:[#allocation142_spill] sm:$0xff]  ;;  %v1236_v8 = vsel %vm1227_vm2, %v1986_v15, %v4479_v27  ;;  %v4481_v4 = vld [vmem:[#allocation93_spill] sm:$0xff] }
 0x240   : > { %v955_v43 = vpop.permute.xlu2 %954  ;;  %v1300_v35 = vsel %vm1293_vm4, %v1267_v2, %v4473_v19  ;;  %v1332_v12 = vsel %vm1326_vm5, %v1299_v13, %v4477_v53  ;;  %v4478_v26 = vld [vmem:[#allocation150_spill] sm:$0xff]  ;;  %v4483_v52 = vld [vmem:[#allocation71_spill] sm:$0xff]  ;;  %v4489_v53 = vld [vmem:[#allocation152_spill] sm:$0xff] }
 0x241   : > { %v935_v39 = vpop.permute.xlu1 %934  ;;  %v3590_v17 = vsel %vm1392_vm7, %v1373_v60, %v955_v43  ;;  %v933_v7 = vpop.permute.xlu0 %932  ;;  %v1333_v10 = vsel %vm1326_vm5, %v1300_v35, %v4478_v26  ;;  %v1365_v43 = vsel %vm1359_vm6, %v1332_v12, %v3211_v29  ;;  %v4484_v11 = vld [vmem:[#allocation130_spill] sm:$0xff]  ;;  %v4485_v19 = vld [vmem:[#allocation131_spill] sm:$0xff]  ;;  %v1988_v27 = vld [vmem:[%s2136_s28 + $0x80] sm:$0xff] }
 0x242   : > { %v3593_v25 = vsel %vm1392_vm7, %v1363_v32, %v935_v39  ;;  %v3596_v47 = vsel %vm1392_vm7, %v1362_v61, %v933_v7  ;;  %v1366_v60 = vsel %vm1359_vm6, %v1333_v10, %v3167_v24  ;;  %v1987_v24 = vld [vmem:[%s2136_s28 + $0x68] sm:$0xff] }
 0x243   : > { %v1237_v29 = vsel %vm1227_vm2, %v1987_v24, %v4480_v1  ;;  %v4486_v14 = vld [vmem:[#allocation30_spill] sm:$0xff]  ;;  %v4491_v1 = vld [vmem:[#allocation75_spill] sm:$0xff] }
 0x244   : > { %v1270_v50 = vsel %vm1260_vm3, %v1237_v29, %v4481_v4  ;;  %v4487_v13 = vld [vmem:[#allocation22_spill] sm:$0xff]  ;;  %v4492_v29 = vld [vmem:[#allocation96_spill] sm:$0xff] }
 0x246   : > { %1135 = vrot.lane.b32.xlu2 %v4472_v49, %s2062_s9  ;;  %v1303_v49 = vsel %vm1293_vm4, %v1270_v50, %v4484_v11  ;;  %v4496_v11 = vld [vmem:[#allocation134_spill] sm:$0xff] }
 0x247   : > { %1167 = vrot.lane.b32.xlu1 %v4475_v57, %s2062_s9  ;;  %1066 = vrot.lane.b32.xlu0 %v4476_v62, %s2061_s8  ;;  %v4488_v57 = vld [vmem:[#allocation143_spill] sm:$0xff]  ;;  %v1336_v12 = vsel %vm1326_vm5, %v1303_v49, %v4489_v53 }
 0x248   : > { %v961_v42 = vpop.permute.xlu2 %960  ;;  %v1369_v10 = vsel %vm1359_vm6, %v1336_v12, %v3179_v37  ;;  %v1989_v37 = vld [vmem:[%s2136_s28 + $0x90] sm:$0xff] }
 0x249   : > { %v941_v32 = vpop.permute.xlu1 %940  ;;  %v3628_v61 = vsel %vm1392_vm7, %v3322_v46, %v961_v42  ;;  %v939_v39 = vpop.permute.xlu0 %938  ;;  %v4482_v46 = vld [vmem:[#allocation101_spill] sm:$0xff] }
 0x24a   : > { %v3631_v7 = vsel %vm1392_vm7, %v1366_v60, %v941_v32  ;;  %v3634_v9 = vsel %vm1392_vm7, %v1365_v43, %v939_v39  ;;  %v1269_v2 = vsel %vm1260_vm3, %v1236_v8, %v4482_v46  ;;  %v4490_v8 = vld [vmem:[#allocation49_spill] sm:$0xff]  ;;  %v4494_v46 = vld [vmem:[#allocation46_spill] sm:$0xff] }
 0x24b   : > { %v1302_v35 = vsel %vm1293_vm4, %v1269_v2, %v4485_v19  ;;  %v1239_v24 = vsel %vm1227_vm2, %v1988_v27, %v4490_v8  ;;  %v4495_v2 = vld [vmem:[#allocation133_spill] sm:$0xff]  ;;  %v4497_v19 = vld [vmem:[#allocation44_spill] sm:$0xff]  ;;  %v1990_v8 = vld [vmem:[%s2136_s28 + $0xa8] sm:$0xff] }
 0x24c   : > { %v1335_v62 = vsel %vm1326_vm5, %v1302_v35, %v4488_v57  ;;  %v4498_v35 = vld [vmem:[#allocation82_spill] sm:$0xff] }
 0x24d   : > { %v1368_v42 = vsel %vm1359_vm6, %v1335_v62, %v3232_v63  ;;  %v1240_v63 = vsel %vm1227_vm2, %v1989_v37, %v4491_v1  ;;  %v4500_v57 = vld [vmem:[#allocation154_spill] sm:$0xff] }
 0x24e   : > { %1169 = vrot.lane.b32.xlu2 %v4483_v52, %s2062_s9  ;;  %v1273_v4 = vsel %vm1260_vm3, %v1240_v63, %v4492_v29  ;;  %v4504_v63 = vld [vmem:[#allocation136_spill] sm:$0xff]  ;;  %v4505_v29 = vld [vmem:[#allocation29_spill] sm:$0xff] }
 0x24f   : > { %1078 = vrot.lane.b32.xlu1 %v4486_v14, %s2061_s8  ;;  %1068 = vrot.lane.b32.xlu0 %v4487_v13, %s2061_s8  ;;  %v1306_v52 = vsel %vm1293_vm4, %v1273_v4, %v4495_v2  ;;  %v4499_v14 = vld [vmem:[#allocation145_spill] sm:$0xff]  ;;  %v4506_v4 = vld [vmem:[#allocation28_spill] sm:$0xff] }
 0x250   : > { %v967_v26 = vpop.permute.xlu2 %966  ;;  %v1339_v62 = vsel %vm1326_vm5, %v1306_v52, %v4500_v57 }
 0x251   : > { %v947_v60 = vpop.permute.xlu1 %946  ;;  %v3666_v43 = vsel %vm1392_vm7, %v3370_v33, %v967_v26  ;;  %v945_v32 = vpop.permute.xlu0 %944  ;;  %v4493_v33 = vld [vmem:[#allocation103_spill] sm:$0xff]  ;;  %v1372_v12 = vsel %vm1359_vm6, %v1339_v62, %v3191_v48  ;;  %v4502_v48 = vld [vmem:[#allocation106_spill] sm:$0xff] }
 0x252   : > { %v3669_v39 = vsel %vm1392_vm7, %v1369_v10, %v947_v60  ;;  %v3672_v15 = vsel %vm1392_vm7, %v1368_v42, %v945_v32  ;;  %v1272_v50 = vsel %vm1260_vm3, %v1239_v24, %v4493_v33  ;;  %v4501_v24 = vld [vmem:[#allocation55_spill] sm:$0xff] }
 0x253   : > { %v1305_v49 = vsel %vm1293_vm4, %v1272_v50, %v4496_v11  ;;  %v1242_v37 = vsel %vm1227_vm2, %v1990_v8, %v4501_v24  ;;  %v4507_v33 = vld [vmem:[#allocation147_spill] sm:$0xff]  ;;  %v1492_v8 = vld [vmem:[%s4096_s1 + $0x8] sm:$0xff] }
 0x254   : > { %v1338_v13 = vsel %vm1326_vm5, %v1305_v49, %v4499_v14  ;;  %v1275_v1 = vsel %vm1260_vm3, %v1242_v37, %v4502_v48  ;;  %v4508_v14 = vld [vmem:[#allocation43_spill] sm:$0xff] }
 0x255   : > { %v1371_v26 = vsel %vm1359_vm6, %v1338_v13, %v3253_v20  ;;  %v4503_v20 = vld [vmem:[#allocation70_spill] sm:$0xff] }
 0x256   : > { %1147 = vrot.lane.b32.xlu2 %v4494_v46, %s2062_s9  ;;  %v4509_v13 = vld [vmem:[#allocation14_spill] sm:$0xff] }
 0x257   : > { %1137 = vrot.lane.b32.xlu1 %v4497_v19, %s2062_s9  ;;  %1179 = vrot.lane.b32.xlu0 %v4498_v35, %s2062_s9 }
 0x258   : > { %v973_v53 = vpop.permute.xlu2 %972 }
 0x259   : > { %v953_v10 = vpop.permute.xlu1 %952  ;;  %v3704_v42 = vsel %vm1392_vm7, %v3414_v45, %v973_v53  ;;  %v951_v60 = vpop.permute.xlu0 %950  ;;  %v1308_v45 = vsel %vm1293_vm4, %v1275_v1, %v4504_v63 }
 0x25a   : > { %v3707_v32 = vsel %vm1392_vm7, %v1372_v12, %v953_v10  ;;  %v3710_v27 = vsel %vm1392_vm7, %v1371_v26, %v951_v60  ;;  %v1341_v50 = vsel %vm1326_vm5, %v1308_v45, %v4507_v33  ;;  %v1495_v26 = vld [vmem:[%s4096_s1 + $0x20] sm:$0xf]  ;;  %v1494_v10 = vld [vmem:[%s4096_s1 + $0x18] sm:$0xff]  ;;  %v4513_v60 = vld [vmem:[#allocation54_spill] sm:$0xff] }
 0x25b   : > { %v1374_v2 = vsel %vm1359_vm6, %v1341_v50, %v3275_v6  ;;  %v4510_v6 = vld [vmem:[#allocation81_spill] sm:$0xff]  ;;  %1862 = vmatpush.msk.msra.mxu0 %vm1597_vm8, %v1495_v26  ;;  %1902 = vmatpush.msk.msra.mxu2 %vm1597_vm8, %v1495_v26 }
 0x25c   : > { %1901 = vmatpush.msk.msra.mxu1 %vm1597_vm8, %v1495_v26  ;;  %1903 = vmatpush.msk.msra.mxu3 %vm1597_vm8, %v1495_v26  ;;  %v1491_v45 = vld [vmem:[%s4096_s1] sm:$0xff]  ;;  %v1025_v26 = vrot.slane %v3328_v28, 1 }
 0x25d   : > { %1613 = vmatpush.msra.mxu0 %v1494_v10  ;;  %1905 = vmatpush.msra.mxu2 %v1494_v10 }
 0x25e   : > { %1171 = vrot.lane.b32.xlu2 %v4503_v20, %s2062_s9  ;;  %1904 = vmatpush.msra.mxu1 %v1494_v10 }
 0x25f   : > { %1080 = vrot.lane.b32.xlu1 %v4505_v29, %s2061_s8  ;;  %1070 = vrot.lane.b32.xlu0 %v4506_v4, %s2061_s8 }
 0x260   : > { %v979_v46 = vpop.permute.xlu2 %978  ;;  %1906 = vmatpush.msra.mxu3 %v1494_v10  ;;  %v4521_v10 = vld [vmem:[#allocation52_spill] sm:$0xff] }
 0x261   : > { %v959_v52 = vpop.permute.xlu1 %958  ;;  %v3731_v11 = vsel %vm1392_vm7, %v3458_v21, %v979_v46  ;;  %v957_v49 = vpop.permute.xlu0 %956  ;;  %v4516_v46 = vld [vmem:[#allocation26_spill] sm:$0xff] }
 0x262   : > { %v3735_v19 = vsel %vm1392_vm7, %v3214_v5, %v959_v52  ;;  %v3738_v35 = vsel %vm1392_vm7, %v1374_v2, %v957_v49  ;;  %v4518_v2 = vld [vmem:[#allocation42_spill] sm:$0xff] }
 0x266   : > { %1139 = vrot.lane.b32.xlu2 %v4508_v14, %s2062_s9 }
 0x267   : > { %1048 = vrot.lane.b32.xlu1 %v4509_v13, %s2061_s8  ;;  %1181 = vrot.lane.b32.xlu0 %v4510_v6, %s2062_s9  ;;  %v4519_v6 = vld [vmem:[#allocation77_spill] sm:$0xff] }
 0x268   : > { %v985_v57 = vpop.permute.xlu2 %984 }
 0x269   : > { %v965_v21 = vpop.permute.xlu1 %964  ;;  %v3748_v62 = vsel %vm1392_vm7, %v3502_v0, %v985_v57  ;;  %v963_v5 = vpop.permute.xlu0 %962  ;;  %v4512_v0 = vld [vmem:[#allocation27_spill] sm:$0xff]  ;;  %v4520_v57 = vld [vmem:[#allocation34_spill] sm:$0xff] }
 0x26a   : > { %v3752_v53 = vsel %vm1392_vm7, %v3235_v30, %v965_v21  ;;  %v3756_v12 = vsel %vm1392_vm7, %v3319_v31, %v963_v5  ;;  %v1493_v30 = vld [vmem:[%s4096_s1 + $0x10] sm:$0xff] }
 0x26b   : > { %v4511_v31 = vld [vmem:[#allocation35_spill] sm:$0xff]  ;;  %1614 = vmatpush.msra.mxu0 %v1493_v30  ;;  %1908 = vmatpush.msra.mxu2 %v1493_v30 }
 0x26c   : > { %1907 = vmatpush.msra.mxu1 %v1493_v30  ;;  %1909 = vmatpush.msra.mxu3 %v1493_v30 }
 0x26d   : > { %1615 = vmatpush.msra.mxu0 %v1492_v8  ;;  %1911 = vmatpush.msra.mxu2 %v1492_v8 }
 0x26e   : > { %1082 = vrot.lane.b32.xlu2 %v4511_v31, %s2061_s8  ;;  %1910 = vmatpush.msra.mxu1 %v1492_v8  ;;  %v4522_v31 = vld [vmem:[#allocation48_spill] sm:$0xff] }
 0x26f   : > { %1072 = vrot.lane.b32.xlu1 %v4512_v0, %s2061_s8  ;;  %1149 = vrot.lane.b32.xlu0 %v4513_v60, %s2062_s9  ;;  %v4523_v0 = vld [vmem:[#allocation18_spill] sm:$0xff] }
 0x270   : > { %v991_v24 = vpop.permute.xlu2 %990  ;;  %1616 = vmatpush.msra.mxu0 %v1491_v45  ;;  %1914 = vmatpush.msra.mxu2 %v1491_v45 }
 0x271   : > { %v971_v37 = vpop.permute.xlu1 %970  ;;  %v3778_v48 = vsel %vm1392_vm7, %v3548_v41, %v991_v24  ;;  %v969_v1 = vpop.permute.xlu0 %968  ;;  %1913 = vmatpush.msra.mxu1 %v1491_v45  ;;  %1912 = vmatpush.msra.mxu3 %v1492_v8  ;;  %v4514_v41 = vld [vmem:[#allocation13_spill] sm:$0xff]  ;;  %v1127_v24 = vrot.slane %v3325_v56, 2 }
 0x272   : > { %v3782_v20 = vsel %vm1392_vm7, %v3256_v18, %v971_v37  ;;  %v3786_v63 = vsel %vm1392_vm7, %v3367_v54, %v969_v1  ;;  %v4515_v18 = vld [vmem:[#allocation78_spill] sm:$0xff] }
 0x273   : > { %1915 = vmatpush.msra.mxu3 %v1491_v45  ;;  %v4524_v45 = vld [vmem:[#allocation76_spill] sm:$0xff] }
 0x276   : > { %1050 = vrot.lane.b32.xlu2 %v4514_v41, %s2061_s8 }
 0x277   : > { %1183 = vrot.lane.b32.xlu1 %v2708_v40, %s2062_s9  ;;  %1173 = vrot.lane.b32.xlu0 %v4515_v18, %s2062_s9  ;;  %v4517_v40 = vld [vmem:[#allocation53_spill] sm:$0xff]  ;;  %v4525_v18 = vld [vmem:[#allocation139_spill] sm:$0xff] }
 0x278   : > { %v1035_v54 = vpop.permute.xlu2 %1034 }
 0x279   : > { %v977_v29 = vpop.permute.xlu1 %976  ;;  %v975_v4 = vpop.permute.xlu0 %974 }
 0x27a   : > { %v3799_v33 = vsel %vm1392_vm7, %v3278_v22, %v977_v29  ;;  %v3803_v50 = vsel %vm1392_vm7, %v3411_v51, %v975_v4  ;;  %v4526_v29 = vld [vmem:[#allocation31_spill] sm:$0xff] }
 0x27e   : > { %1074 = vrot.lane.b32.xlu2 %v4516_v46, %s2061_s8 }
 0x27f   : > { %1151 = vrot.lane.b32.xlu1 %v4517_v40, %s2062_s9  ;;  %1141 = vrot.lane.b32.xlu0 %v4518_v2, %s2062_s9  ;;  %v4527_v2 = vld [vmem:[#allocation47_spill] sm:$0xff] }
 0x280   : > { %v1041_v52 = vpop.permute.xlu2 %1040 }
 0x281   : > { %v983_v49 = vpop.permute.xlu1 %982  ;;  %v3813_v22 = vsel %vm1425_vm9, %v3634_v9, %v1041_v52  ;;  %v981_v14 = vpop.permute.xlu0 %980  ;;  %v4528_v52 = vld [vmem:[#allocation17_spill] sm:$0xff] }
 0x282   : > { %v3817_v51 = vsel %vm1392_vm7, %v3316_v36, %v983_v49  ;;  %v3821_v13 = vsel %vm1392_vm7, %v3455_v59, %v981_v14  ;;  %v1026_v36 = vrot.slane %v3325_v56, 1  ;;  %v4529_v49 = vld [vmem:[#allocation155_spill] sm:$0xff]  ;;  %v4538_v56 = vld [vmem:[#allocation66_spill] sm:$0xff] }
 0x284   : > { %v1027_v30 = vsel %vm271_vm0, %v1025_v26, %v1026_v36 }
 0x286   : > { %1185 = vrot.lane.b32.xlu2 %v2730_v55, %s2062_s9 }
 0x287   : > { %1175 = vrot.lane.b32.xlu1 %v4519_v6, %s2062_s9  ;;  %1084 = vrot.lane.b32.xlu0 %v4520_v57, %s2061_s8 }
 0x288   : > { %v1047_v9 = vpop.permute.xlu2 %1046 }
 0x289   : > { %v989_v21 = vpop.permute.xlu1 %988  ;;  %v987_v5 = vpop.permute.xlu0 %986 }
 0x28a   : > { %v3833_v59 = vsel %vm1392_vm7, %v3364_v3, %v989_v21  ;;  %v3837_v55 = vsel %vm1392_vm7, %v3499_v38, %v987_v5  ;;  %v1126_v38 = vrot.slane %v3328_v28, 2 }
 0x28c   : > { %v1128_v41 = vsel %vm448_vm1, %v1126_v38, %v1127_v24  ;;  %v1434_v38 = vsel %vm1425_vm9, %v3672_v15, %v1047_v9  ;;  %v4536_v15 = vld [vmem:[#allocation21_spill] sm:$0xff] }
 0x28e   : > { %1153 = vrot.lane.b32.xlu2 %v4521_v10, %s2062_s9  ;;  %v4530_v10 = vld [vmem:[#allocation156_spill] sm:$0xff] }
 0x28f   : > { %1143 = vrot.lane.b32.xlu1 %v4522_v31, %s2062_s9  ;;  %1052 = vrot.lane.b32.xlu0 %v4523_v0, %s2061_s8 }
 0x290   : > { %v1132_v60 = vpop.permute.xlu2 %1131 }
 0x291   : > { %v1033_v3 = vpop.permute.xlu1 %1032  ;;  %v1031_v8 = vpop.permute.xlu0 %1030 }
 0x292   : > { %v1426_v37 = vsel %vm1425_vm9, %v3545_v34, %v1031_v8  ;;  %v1427_v28 = vsel %vm1425_vm9, %v3408_v44, %v1033_v3  ;;  %v1428_v44 = vsel %vm1425_vm9, %v3596_v47, %v1035_v54  ;;  %v4531_v47 = vld [vmem:[#allocation138_spill] sm:$0xff]  ;;  %v4532_v54 = vld [vmem:[#allocation60_spill] sm:$0xff]  ;;  %v4533_v3 = vld [vmem:[#allocation59_spill] sm:$0xff] }
 0x293   : > { %v1459_v1 = vsel %vm1458_vm10, %v1426_v37, %v1132_v60  ;;  %v4534_v8 = vld [vmem:[#allocation16_spill] sm:$0xff] }
 0x294   : > { %1863 = vmatmul.msk.f32.vlgmr.msra.gmra.mxu0 %vm1500_vm11, %v1459_v1 }
 0x296   : > { %1177 = vrot.lane.b32.xlu2 %v4524_v45, %s2062_s9 }
 0x297   : > { %1086 = vrot.lane.b32.xlu1 %v4525_v18, %s2061_s8  ;;  %1076 = vrot.lane.b32.xlu0 %v4526_v29, %s2061_s8  ;;  %v222_v29 = vld [vmem:[%s2136_s28 + $0x1a8] sm:$0x3] }
 0x298   : > { %v1134_v4 = vpop.permute.xlu2 %1133 }
 0x299   : > { %v3863_v34 = vpop.permute.xlu1 %1038  ;;  %v1037_v46 = vpop.permute.xlu0 %1036  ;;  %v1460_v40 = vsel %vm1458_vm10, %v1427_v28, %v1134_v4  ;;  %v4535_v28 = vld [vmem:[#allocation58_spill] sm:$0xff]  ;;  %v1028_v4 = vrot.slane %v222_v29, 1 }
 0x29c   : > { %1864 = vmatmul.msk.f32.gmra.mxu0 %vm1500_vm11, %v1460_v40  ;;  %v1129_v40 = vrot.slane %v222_v29, 2 }
 0x29e   : > { %1145 = vrot.lane.b32.xlu2 %v4527_v2, %s2062_s9 }
 0x29f   : > { %1054 = vrot.lane.b32.xlu1 %v4528_v52, %s2061_s8  ;;  %1187 = vrot.lane.b32.xlu0 %v4529_v49, %s2062_s9 }
 0x2a0   : > { %v1136_v14 = vpop.permute.xlu2 %1135 }
 0x2a1   : > { %v1045_v6 = vpop.permute.xlu1 %1044  ;;  %v1043_v57 = vpop.permute.xlu0 %1042  ;;  %v1461_v21 = vsel %vm1458_vm10, %v1428_v44, %v1136_v14  ;;  %v1029_v44 = vsel %vm271_vm0, %v1026_v36, %v1028_v4  ;;  %v1130_v14 = vsel %vm448_vm1, %v1127_v24, %v1129_v40  ;;  %v1429_v36 = vsel %vm1425_vm9, %v3593_v25, %v1037_v46 }
 0x2a2   : > { %v3878_v5 = vsel %vm1425_vm9, %v3496_v16, %v1045_v6  ;;  %v3882_v26 = vsel %vm1425_vm9, %v3631_v7, %v1043_v57 }
 0x2a4   : > { %1865 = vmatmul.msk.f32.gmra.mxu0 %vm1500_vm11, %v1461_v21 }
 0x2a6   : > { %1189 = vrot.lane.b32.xlu2 %v4530_v10, %s2062_s9 }
 0x2a7   : > { %1088 = vrot.lane.b32.xlu1 %v4531_v47, %s2061_s8  ;;  %1155 = vrot.lane.b32.xlu0 %v4532_v54, %s2062_s9 }
 0x2a8   : > { %v1170_v31 = vpop.permute.xlu2 %1169 }
 0x2a9   : > { %v1164_v0 = vpop.permute.xlu1 %1163  ;;  %v1063_v60 = vpop.permute.xlu0 %1062 }
 0x2aa   : > { %v1442_v16 = vsel %vm1425_vm9, %v3628_v61, %v1063_v60 }
 0x2ab   : > { %v1475_v7 = vsel %vm1458_vm10, %v1442_v16, %v1164_v0 }
 0x2ac   : > { %1879 = vmatmul.msk.f32.vlgmr.msra.gmra.mxu2 %vm1500_vm11, %v1475_v7 }
 0x2ae   : > { %1090 = vrot.lane.b32.xlu2 %v1027_v30, %s2061_s8 }
 0x2af   : > { %1157 = vrot.lane.b32.xlu1 %v4533_v3, %s2062_s9  ;;  %1056 = vrot.lane.b32.xlu0 %v4534_v8, %s2061_s8 }
 0x2b0   : > { %v1148_v37 = vpop.permute.xlu2 %1147 }
 0x2b1   : > { %v1166_v1 = vpop.permute.xlu1 %1165  ;;  %v1065_v45 = vpop.permute.xlu0 %1064  ;;  %v1467_v61 = vsel %vm1458_vm10, %v1434_v38, %v1148_v37 }
 0x2b2   : > { %v1443_v18 = vsel %vm1425_vm9, %v3756_v12, %v1065_v45  ;;  %1871 = vmatmul.msk.f32.vlgmr.msra.gmra.mxu1 %vm1500_vm11, %v1467_v61 }
 0x2b3   : > { %v1476_v30 = vsel %vm1458_vm10, %v1443_v18, %v1166_v1 }
 0x2b4   : > { %1880 = vmatmul.msk.f32.gmra.mxu2 %vm1500_vm11, %v1476_v30 }
 0x2b6   : > { %1159 = vrot.lane.b32.xlu2 %v4535_v28, %s2062_s9 }
 0x2b7   : > { %1058 = vrot.lane.b32.xlu1 %v4536_v15, %s2061_s8  ;;  %1191 = vrot.lane.b32.xlu0 %v1128_v41, %s2062_s9  ;;  %v4537_v41 = vld [vmem:[#allocation20_spill] sm:$0xff] }
 0x2b8   : > { %v1172_v9 = vpop.permute.xlu2 %1171 }
 0x2b9   : > { %v1168_v2 = vpop.permute.xlu1 %1167  ;;  %v1067_v12 = vpop.permute.xlu0 %1066 }
 0x2ba   : > { %v1444_v52 = vsel %vm1425_vm9, %v3752_v53, %v1067_v12 }
 0x2bb   : > { %v1477_v49 = vsel %vm1458_vm10, %v1444_v52, %v1168_v2 }
 0x2bc   : > { %1881 = vmatmul.msk.f32.gmra.mxu2 %vm1500_vm11, %v1477_v49 }
 0x2be   : > { %1060 = vrot.lane.b32.xlu2 %v4537_v41, %s2061_s8 }
 0x2bf   : > { %1092 = vrot.lane.b32.xlu0 %v1029_v44, %s2061_s8  ;;  %1193 = vrot.lane.b32.xlu1 %v1130_v14, %s2062_s9 }
 0x2c0   : > { %v1140_v6 = vpop.permute.xlu2 %1139 }
 0x2c1   : > { %v1079_v57 = vpop.permute.xlu1 %1078  ;;  %v1069_v53 = vpop.permute.xlu0 %1068 }
 0x2c2   : > { %v1445_v21 = vsel %vm1425_vm9, %v3666_v43, %v1069_v53  ;;  %v1450_v24 = vsel %vm1425_vm9, %v3799_v33, %v1079_v57 }
 0x2c3   : > { %v1478_v10 = vsel %vm1458_vm10, %v1445_v21, %v1170_v31  ;;  %v1430_v31 = vsel %vm1425_vm9, %v3452_v58, %v3863_v34 }
 0x2c4   : > { %1882 = vmatmul.msk.f32.gmra.mxu2 %vm1500_vm11, %v1478_v10  ;;  %v1463_v46 = vsel %vm1458_vm10, %v1430_v31, %v1140_v6 }
 0x2c7   : > { %1161 = vrot.lane.b32.xlu0 %v4538_v56, %s2062_s9  ;;  %s1792_s9 = scalar_lea.hbm %s4098_s3, %s1900_s6 }
 0x2c8   : > { %v1083_v0 = vpop.permute.xlu2 %1082  ;;  %s1796_s17 = sshll.u32 %s1792_s9, 4  ;;  %s1797_s17 = int_to_ptr.hbm [resolvable:$true] %s1796_s17 }
 0x2c9   : > { %v1138_v47 = vpop.permute.xlu1 %1137  ;;  %v1180_v54 = vpop.permute.xlu0 %1179  ;;  %s2005_s20 = sshra.s32 %s1797_s17, 4  ;;  %s2006_s20 = int_to_ptr.hbm [resolvable:$true] %s2005_s20 }
 0x2ca   : > { %v1462_v60 = vsel %vm1458_vm10, %v1429_v36, %v1138_v47  ;;  %v1483_v43 = vsel %vm1458_vm10, %v1450_v24, %v1180_v54  ;;  %s2007_s24 = scalar_lea.hbm %s2006_s20, 16  ;;  %p2012_p0 = scmp.lt.s32.totalorder %s2006_s20, %s4098_s3 }
 0x2cb   : > { %1866 = vmatmul.msk.f32.gmra.mxu0 %vm1500_vm11, %v1462_v60  ;;  %1887 = vmatmul.msk.f32.vlgmr.msra.gmra.mxu3 %vm1500_vm11, %v1483_v43  ;;  %p2008_p11 = scmp.ne.s32.totalorder %s2006_s20, %s2007_s24  ;;  %p2013_p1 = scmp.lt.s32.totalorder %s2011_s26, %s2007_s24 }
 0x2cd   : > { %p2009_p12 = pnand %p2008_p11, %p2121_p5  ;;  %p2014_p2 = por %p2013_p1, %p2012_p0 }
 0x2cf   : > { %p2010_p13 = pneg %p2009_p12 }
 0x2d0   : > { %v1051_v3 = vpop.permute.xlu2 %1050 }
 0x2d1   : > { %v1081_v16 = vpop.permute.xlu1 %1080  ;;  %v1071_v25 = vpop.permute.xlu0 %1070  ;;  %p2015_p3 = pnand %p2014_p2, %p2010_p13 }
 0x2d2   : > { %v1446_v33 = vsel %vm1425_vm9, %v3786_v63, %v1071_v25  ;;  %v1451_v8 = vsel %vm1425_vm9, %v3731_v11, %v1081_v16  ;;  %v1452_v11 = vsel %vm1425_vm9, %v3821_v13, %v1083_v0 }
 0x2d3   : > { %1867 = vmatmul.msk.f32.gmra.mxu0 %vm1500_vm11, %v1463_v46  ;;  %v1479_v7 = vsel %vm1458_vm10, %v1446_v33, %v1172_v9 }
 0x2d4   : > { %1883 = vmatmul.msk.f32.gmra.mxu2 %vm1500_vm11, %v1479_v7 }
 0x2d8   : > { %v1075_v34 = vpop.permute.xlu2 %1074 }
 0x2d9   : > { %v1049_v38 = vpop.permute.xlu1 %1048  ;;  %v1182_v37 = vpop.permute.xlu0 %1181  ;;  %v1448_v12 = vsel %vm1425_vm9, %v3704_v42, %v1075_v34 }
 0x2da   : > { %v1484_v58 = vsel %vm1458_vm10, %v1451_v8, %v1182_v37  ;;  %v1435_v63 = vsel %vm1425_vm9, %v3669_v39, %v1049_v38  ;;  %v1436_v39 = vsel %vm1425_vm9, %v3542_v23, %v1051_v3 }
 0x2db   : > { %1888 = vmatmul.msk.f32.gmra.mxu3 %vm1500_vm11, %v1484_v58 }
 0x2e0   : > { %v1186_v18 = vpop.permute.xlu2 %1185 }
 0x2e1   : > { %v1073_v1 = vpop.permute.xlu1 %1072  ;;  %v1150_v45 = vpop.permute.xlu0 %1149 }
 0x2e2   : > { %v1468_v61 = vsel %vm1458_vm10, %v1435_v63, %v1150_v45  ;;  %v1447_v30 = vsel %vm1425_vm9, %v3782_v20, %v1073_v1 }
 0x2e3   : > { %1872 = vmatmul.msk.f32.gmra.mxu1 %vm1500_vm11, %v1468_v61 }
 0x2e8   : > { %v1154_v2 = vpop.permute.xlu2 %1153 }
 0x2e9   : > { %v1184_v29 = vpop.permute.xlu1 %1183  ;;  %v1174_v28 = vpop.permute.xlu0 %1173 }
 0x2ea   : > { %v1480_v15 = vsel %vm1458_vm10, %v1447_v30, %v1174_v28  ;;  %v1485_v9 = vsel %vm1458_vm10, %v1452_v11, %v1184_v29 }
 0x2eb   : > { %1884 = vmatmul.msk.f32.gmra.mxu2 %vm1500_vm11, %v1480_v15  ;;  %1889 = vmatmul.msk.f32.gmra.mxu3 %vm1500_vm11, %v1485_v9 }
 0x2f0   : > { %v1178_v14 = vpop.permute.xlu2 %1177 }
 0x2f1   : > { %v1152_v4 = vpop.permute.xlu1 %1151  ;;  %v1142_v40 = vpop.permute.xlu0 %1141 }
 0x2f2   : > { %v1464_v13 = vsel %vm1458_vm10, %v3813_v22, %v1142_v40  ;;  %v1469_v20 = vsel %vm1458_vm10, %v1436_v39, %v1152_v4 }
 0x2f3   : > { %1868 = vmatmul.msk.f32.gmra.mxu0 %vm1500_vm11, %v1464_v13  ;;  %1873 = vmatmul.msk.f32.gmra.mxu1 %vm1500_vm11, %v1469_v20 }
 0x2f8   : > { %v1146_v53 = vpop.permute.xlu2 %1145 }
 0x2f9   : > { %v1176_v52 = vpop.permute.xlu1 %1175  ;;  %v1085_v49 = vpop.permute.xlu0 %1084  ;;  %v1466_v36 = vsel %vm1458_vm10, %v3878_v5, %v1146_v53 }
 0x2fa   : > { %v1453_v23 = vsel %vm1425_vm9, %v3817_v51, %v1085_v49  ;;  %v1481_v44 = vsel %vm1458_vm10, %v1448_v12, %v1176_v52 }
 0x2fb   : > { %1885 = vmatmul.msk.f32.gmra.mxu2 %vm1500_vm11, %v1481_v44  ;;  %v1486_v22 = vsel %vm1458_vm10, %v1453_v23, %v1186_v18 }
 0x2fc   : > { %1890 = vmatmul.msk.f32.gmra.mxu3 %vm1500_vm11, %v1486_v22 }
 0x300   : > { %v1190_v60 = vpop.permute.xlu2 %1189 }
 0x301   : > { %v1144_v41 = vpop.permute.xlu1 %1143  ;;  %v1053_v6 = vpop.permute.xlu0 %1052 }
 0x302   : > { %v1437_v57 = vsel %vm1425_vm9, %v3710_v27, %v1053_v6  ;;  %v1465_v42 = vsel %vm1458_vm10, %v3882_v26, %v1144_v41  ;;  %v3997_v26 = vld [vmem:[%s4097_s2] ss:$0 sm:$0xff] }
 0x303   : > { %1869 = vmatmul.msk.f32.gmra.mxu0 %vm1500_vm11, %v1465_v42  ;;  %v1470_v51 = vsel %vm1458_vm10, %v1437_v57, %v1154_v2 }
 0x304   : > { %1874 = vmatmul.msk.f32.gmra.mxu1 %vm1500_vm11, %v1470_v51 }
 0x308   : > { %v1091_v3 = vpop.permute.xlu2 %1090 }
 0x309   : > { %v1087_v21 = vpop.permute.xlu1 %1086  ;;  %v1077_v10 = vpop.permute.xlu0 %1076  ;;  %v1456_v63 = vsel %vm1425_vm9, %v3833_v59, %v1091_v3 }
 0x30a   : > { %v1449_v56 = vsel %vm1425_vm9, %v3803_v50, %v1077_v10  ;;  %v1454_v54 = vsel %vm1425_vm9, %v3748_v62, %v1087_v21 }
 0x30b   : > { %1870 = vmatmul.msk.f32.gmra.mxu0 %vm1500_vm11, %v1466_v36  ;;  %v1482_v27 = vsel %vm1458_vm10, %v1449_v56, %v1178_v14 }
 0x30c   : > { %1886 = vmatmul.msk.f32.gmra.mxu2 %vm1500_vm11, %v1482_v27 }
 0x310   : > { %v1160_v1 = vpop.permute.xlu2 %1159 }
 0x311   : > { %v1055_v24 = vpop.permute.xlu1 %1054  ;;  %v1618_v47 = vpop.f32.mrf.mxu0 }
 0x312   : > { %v1619_v50 = vadd.f32 %v3997_v26, %v1618_v47  ;;  %v1188_v0 = vpop.permute.xlu0 %1187  ;;  %v1438_v16 = vsel %vm1425_vm9, %v3707_v32, %v1055_v24 }
 0x313   : > { %v1487_v5 = vsel %vm1458_vm10, %v1454_v54, %v1188_v0 }
 0x314   : > { %1891 = vmatmul.msk.f32.gmra.mxu3 %vm1500_vm11, %v1487_v5  ;;  %1714 = vxpose.xlu1.b32.start [1/16] (narrow) %v1619_v50, 8 }
 0x318   : > { %v1061_v15 = vpop.permute.xlu2 %1060 }
 0x319   : > { %v1089_v43 = vpop.permute.xlu1 %1088  ;;  %v1621_v31 = vpop.f32.mrf.mxu0  ;;  %v1441_v4 = vsel %vm1425_vm9, %v3735_v19, %v1061_v15 }
 0x31a   : > { %v1455_v25 = vsel %vm1425_vm9, %v3837_v55, %v1089_v43  ;;  %v1622_v33 = vadd.f32 %v3997_v26, %v1621_v31  ;;  %v1156_v62 = vpop.permute.xlu0 %1155 }
 0x31b   : > { %v1471_v46 = vsel %vm1458_vm10, %v1438_v16, %v1156_v62  ;;  %v1488_v7 = vsel %vm1458_vm10, %v1455_v25, %v1190_v60 }
 0x31c   : > { %1875 = vmatmul.msk.f32.gmra.mxu1 %vm1500_vm11, %v1471_v46  ;;  %1715 = vxpose.xlu1.b32.cont [2/16] (narrow) %v1622_v33, 8 }
 0x31d   : > { %1892 = vmatmul.msk.f32.gmra.mxu3 %vm1500_vm11, %v1488_v7 }
 0x321   : > { %v1158_v8 = vpop.permute.xlu1 %1157  ;;  %v1624_v38 = vpop.f32.mrf.mxu0 }
 0x322   : > { %v1625_v32 = vadd.f32 %v3997_v26, %v1624_v38  ;;  %v1057_v37 = vpop.permute.xlu0 %1056 }
 0x323   : > { %v1439_v55 = vsel %vm1425_vm9, %v3590_v17, %v1057_v37 }
 0x324   : > { %1716 = vxpose.xlu1.b32.cont [3/16] (narrow) %v1625_v32, 8  ;;  %v1472_v58 = vsel %vm1458_vm10, %v1439_v55, %v1158_v8 }
 0x325   : > { %1876 = vmatmul.msk.f32.gmra.mxu1 %vm1500_vm11, %v1472_v58 }
 0x329   : > { %v1059_v34 = vpop.permute.xlu1 %1058 }
 0x32a   : > { %v1440_v45 = vsel %vm1425_vm9, %v3738_v35, %v1059_v34  ;;  %v1192_v61 = vpop.permute.xlu0 %1191 }
 0x32b   : > { %v1489_v18 = vsel %vm1458_vm10, %v1456_v63, %v1192_v61  ;;  %v1473_v11 = vsel %vm1458_vm10, %v1440_v45, %v1160_v1 }
 0x32c   : > { %1893 = vmatmul.msk.f32.gmra.mxu3 %vm1500_vm11, %v1489_v18 }
 0x32d   : > { %1877 = vmatmul.msk.f32.gmra.mxu1 %vm1500_vm11, %v1473_v11 }
 0x32f   : > { %v1666_v17 = vpop.f32.mrf.mxu2  ;;  %v1642_v36 = vpop.f32.mrf.mxu1 }
 0x330   : > { %v1667_v30 = vadd.f32 %v3997_v26, %v1666_v17  ;;  %v1643_v47 = vadd.f32 %v3997_v26, %v1642_v36 }
 0x331   : > { %v1194_v29 = vpop.permute.xlu1 %1193 }
 0x332   : > { %v1093_v28 = vpop.permute.xlu0 %1092  ;;  %1746 = vxpose.xlu2.b32.start [1/16] (narrow) %v1667_v30, 8 }
 0x333   : > { %v1457_v59 = vsel %vm1425_vm9, %v3778_v48, %v1093_v28 }
 0x334   : > { %v1490_v35 = vsel %vm1458_vm10, %v1457_v59, %v1194_v29 }
 0x335   : > { %1894 = vmatmul.msk.f32.gmra.mxu3 %vm1500_vm11, %v1490_v35 }
 0x337   : > { %v1669_v9 = vpop.f32.mrf.mxu2 }
 0x338   : > { %v1670_v39 = vadd.f32 %v3997_v26, %v1669_v9 }
 0x33a   : > { %v1162_v40 = vpop.permute.xlu0 %1161  ;;  %1747 = vxpose.xlu2.b32.cont [2/16] (narrow) %v1670_v39, 8 }
 0x33b   : > { %v1474_v13 = vsel %vm1458_vm10, %v1441_v4, %v1162_v40 }
 0x33c   : > { %1878 = vmatmul.msk.f32.gmra.mxu1 %vm1500_vm11, %v1474_v13 }
 0x33f   : > { %v1672_v20 = vpop.f32.mrf.mxu2 }
 0x340   : > { %v1673_v48 = vadd.f32 %v3997_v26, %v1672_v20 }
 0x342   : > { %1748 = vxpose.xlu2.b32.cont [3/16] (narrow) %v1673_v48, 8 }
 0x347   : > { %v1675_v2 = vpop.f32.mrf.mxu2 }
 0x348   : > { %v1676_v12 = vadd.f32 %v3997_v26, %v1675_v2  ;;  %v1627_v52 = vpop.f32.mrf.mxu0 }
 0x349   : > { %v1628_v49 = vadd.f32 %v3997_v26, %v1627_v52 }
 0x34a   : > { %1749 = vxpose.xlu2.b32.cont [4/16] (narrow) %v1676_v12, 8 }
 0x34b   : > { %1717 = vxpose.xlu1.b32.cont [4/16] (narrow) %v1628_v49, 8 }
 0x34e   : > { %v1690_v54 = vpop.f32.mrf.mxu3 }
 0x34f   : > { %v1691_v0 = vadd.f32 %v3997_v26, %v1690_v54 }
 0x350   : > { %v1630_v23 = vpop.f32.mrf.mxu0 }
 0x351   : > { %v1631_v19 = vadd.f32 %v3997_v26, %v1630_v23 }
 0x353   : > { %1718 = vxpose.xlu1.b32.cont [5/16] (narrow) %v1631_v19, 8 }
 0x357   : > { %v1678_v44 = vpop.f32.mrf.mxu2 }
 0x358   : > { %v1679_v22 = vadd.f32 %v3997_v26, %v1678_v44 }
 0x35a   : > { %1750 = vxpose.xlu2.b32.cont [5/16] (narrow) %v1679_v22, 8 }
 0x35e   : > { %v1693_v5 = vpop.f32.mrf.mxu3 }
 0x35f   : > { %v1694_v31 = vadd.f32 %v3997_v26, %v1693_v5 }
 0x360   : > { %v1645_v50 = vpop.f32.mrf.mxu1 }
 0x361   : > { %v1646_v60 = vadd.f32 %v3997_v26, %v1645_v50 }
 0x36e   : > { %v1681_v14 = vpop.f32.mrf.mxu2  ;;  %v1696_v16 = vpop.f32.mrf.mxu3 }
 0x36f   : > { %v1682_v41 = vadd.f32 %v3997_v26, %v1681_v14  ;;  %v1697_v62 = vadd.f32 %v3997_v26, %v1696_v16 }
 0x370   : > { %v1633_v6 = vpop.f32.mrf.mxu0  ;;  %v1648_v43 = vpop.f32.mrf.mxu1 }
 0x371   : > { %v1634_v57 = vadd.f32 %v3997_v26, %v1633_v6  ;;  %1751 = vxpose.xlu2.b32.cont [6/16] (narrow) %v1682_v41, 8  ;;  %v1649_v25 = vadd.f32 %v3997_v26, %v1648_v43 }
 0x373   : > { %1719 = vxpose.xlu1.b32.cont [6/16] (narrow) %v1634_v57, 8 }
 0x37e   : > { %v1684_v42 = vpop.f32.mrf.mxu2 }
 0x37f   : > { %v1685_v51 = vadd.f32 %v3997_v26, %v1684_v42  ;;  %v1699_v46 = vpop.f32.mrf.mxu3 }
 0x380   : > { %v1636_v53 = vpop.f32.mrf.mxu0  ;;  %v1700_v8 = vadd.f32 %v3997_v26, %v1699_v46 }
 0x381   : > { %v1637_v21 = vadd.f32 %v3997_v26, %v1636_v53  ;;  %1752 = vxpose.xlu2.b32.cont [7/16] (narrow) %v1685_v51, 8  ;;  %v1651_v33 = vpop.f32.mrf.mxu1 }
 0x382   : > { %v1652_v7 = vadd.f32 %v3997_v26, %v1651_v33 }
 0x383   : > { %1720 = vxpose.xlu1.b32.cont [7/16] (narrow) %v1637_v21, 8 }
 0x388   : > { %v1639_v10 = vpop.f32.mrf.mxu0 }
 0x389   : > { %v1640_v56 = vadd.f32 %v3997_v26, %v1639_v10 }
 0x38b   : > { %1721 = vxpose.xlu1.b32.cont [8/16] (narrow) %v1640_v56, 8 }
 0x38f   : > { %v1687_v27 = vpop.f32.mrf.mxu2 }
 0x390   : > { %v1688_v24 = vadd.f32 %v3997_v26, %v1687_v27 }
 0x392   : > { %1753 = vxpose.xlu2.b32.cont [8/16] (narrow) %v1688_v24, 8 }
 0x393   : > { %1722 = vxpose.xlu1.b32.cont [9/16] (narrow) %v1643_v47, 8 }
 0x397   : > { %v1702_v38 = vpop.f32.mrf.mxu3 }
 0x398   : > { %v1703_v55 = vadd.f32 %v3997_v26, %v1702_v38 }
 0x399   : > { %v1654_v3 = vpop.f32.mrf.mxu1 }
 0x39a   : > { %1754 = vxpose.xlu2.b32.cont [9/16] (narrow) %v1691_v0, 8  ;;  %v1655_v32 = vadd.f32 %v3997_v26, %v1654_v3 }
 0x39b   : > { %1723 = vxpose.xlu1.b32.cont [10/16] (narrow) %v1646_v60, 8 }
 0x3a0   : > { %v1705_v34 = vpop.f32.mrf.mxu3 }
 0x3a1   : > { %v1706_v1 = vadd.f32 %v3997_v26, %v1705_v34 }
 0x3a2   : > { %1755 = vxpose.xlu2.b32.cont [10/16] (narrow) %v1694_v31, 8  ;;  %v1657_v37 = vpop.f32.mrf.mxu1 }
 0x3a3   : > { %1724 = vxpose.xlu1.b32.cont [11/16] (narrow) %v1649_v25, 8  ;;  %v1658_v58 = vadd.f32 %v3997_v26, %v1657_v37 }
 0x3aa   : > { %1756 = vxpose.xlu2.b32.cont [11/16] (narrow) %v1697_v62, 8  ;;  %v1660_v63 = vpop.f32.mrf.mxu1 }
 0x3ab   : > { %1725 = vxpose.xlu1.b32.cont [12/16] (narrow) %v1652_v7, 8  ;;  %v1661_v45 = vadd.f32 %v3997_v26, %v1660_v63 }
 0x3af   : > { %v1708_v61 = vpop.f32.mrf.mxu3 }
 0x3b0   : > { %v1709_v11 = vadd.f32 %v3997_v26, %v1708_v61 }
 0x3b2   : > { %1757 = vxpose.xlu2.b32.cont [12/16] (narrow) %v1700_v8, 8 }
 0x3b3   : > { %1726 = vxpose.xlu1.b32.cont [13/16] (narrow) %v1655_v32, 8 }
 0x3b8   : > { %v1711_v30 = vpop.f32.mrf.mxu3 }
 0x3b9   : > { %v1663_v18 = vpop.f32.mrf.mxu1  ;;  %v1712_v29 = vadd.f32 %v3997_v26, %v1711_v30 }
 0x3ba   : > { %1758 = vxpose.xlu2.b32.cont [13/16] (narrow) %v1703_v55, 8  ;;  %v1664_v17 = vadd.f32 %v3997_v26, %v1663_v18 }
 0x3bb   : > { %1727 = vxpose.xlu1.b32.cont [14/16] (narrow) %v1658_v58, 8 }
 0x3c2   : > { %1759 = vxpose.xlu2.b32.cont [14/16] (narrow) %v1706_v1, 8 }
 0x3c3   : > { %1728 = vxpose.xlu1.b32.cont [15/16] (narrow) %v1661_v45, 8 }
 0x3ca   : > { %1760 = vxpose.xlu2.b32.cont [15/16] (narrow) %v1709_v11, 8 }
 0x3cb   : > { %1729 = vxpose.xlu1.b32.end [16/16] (narrow) %v1664_v17, 8 }
 0x3d2   : > { %1761 = vxpose.xlu2.b32.end [16/16] (narrow) %v1712_v29, 8 }
 0x3f3   : > { %v1762_v28 = vpop.trf.xlu2 }
 0x3f4   : > { %1779 = vst [vmem:[%s163_s10 + $0x8] sm:$0xff] %v1762_v28 }
 0x3f7   : > { %v1730_v59 = vpop.trf.xlu1 }
 0x3f8   : > { %1778 = vst [vmem:[%s163_s10] sm:$0xff] %v1730_v59 }
 0x3f9   : > { %2018 = shalt.err (!%p2015_p3)
}
 0x3fa   : > { %1917 = dma.vmem_to_hbm [thread:$0]  (%p2121_p5), %s1795_s11, 256, %s1797_s17, %s1781_s19  }
 0x3fb PF: > { %p1923_p4 = scmp.ge.s32.totalorder %s2053_s15, 2  ;;  %s1808_s28 = sand.u32 1, %s2041_s12  }
 0x3fc   : > { %s1809_s30 = scalar_lea.sflag [#allocation3], %s1808_s28 }
 0x3fd   : > { %p1920_p7 = pnand %p1923_p4, %p2125_p6 }
 0x3ff   : > { %p1921_p8 = pneg %p1920_p7 }
 0x401   : > { %2036 = dma.done.wait (%p1921_p8), %s1809_s30, 256  }
 0x402   : > { %2038 = vsyncadd (%p1921_p8), %s1809_s30, 4294967040  ;;  %p13_p9 = scmp.ge.s32.totalorder %s2108_s18, 4   ;;  %s4539_s12 = smov %s2045_s13 }
 0x403   : > { %s4540_s13 = smov %s2049_s14  ;;  %s4541_s14 = smov %s2119_s21 }
 0x404   : > { %s4542_s15 = smov %s2108_s18  ;;  %15 = sbr.rel (!%p13_p9) target bundleno = 3 (0x3), region = 67 }
 0x409   :  { %1815 = vsyncpa [#allocation3], 1 }
 0x40a   :  { %1817 = vsyncpa [#allocation3 + $0x1], 1 }

</bundles_post_ra>
